<compile_context>
chip_gen: v6e
topology: v6e:2x2x1
jax: 0.10.0
libtpu: 0.0.40
codegen_flags: <defaults>
</compile_context>

<pallas_src>
import functools

import jax
import jax.numpy as jnp
import numpy as np
from jax.experimental import pallas as pl
from jax.experimental.pallas import tpu as pltpu

INPUT_SIZE = 90
EMB_DIM = 8
HIDDEN_DIM = 64
LANE = 128          # padded feature width used everywhere inside the kernel
SLOPE = 0.01        # LeakyReLU default negative_slope
EPS = 1e-5          # BatchNorm1d default eps
ROW_ALIGN = 16      # bf16 native sublane packing: (16, 128) tiles

# indices into the packed weight stack (7, 128, 128)
W_ENC0, W_ENC1, W_ENC2, W_ENC3, W_CMP0, W_CMP1, W_CMP2 = range(7)
# indices into the packed vector stack (16, 128)
(V_ENC_B0, V_BN_G0, V_BN_B0,
 V_ENC_B1, V_BN_G1, V_BN_B1,
 V_ENC_B2, V_BN_G2, V_BN_B2,
 V_ENC_B3, V_CMP_B0, V_CMP_B1, V_CMP_B2) = range(13)
N_VECS = 16         # 13 vectors padded up to a sublane multiple


# ---------------------------------------------------------------------------
# Pallas kernel: full forward pass (both encoders + comparison head).
# ---------------------------------------------------------------------------
def _equity_kernel(h1_ref, h2_ref, w_ref, v_ref, out_ref, *, batch):
    bp = h1_ref.shape[0]
    vecs = v_ref[...]                                  # (16, 128) f32, loaded once

    def vrow(i):                                       # (1, 128) bias/gamma/beta row
        return vecs[i:i + 1, :]

    inv_b = 1.0 / batch
    if batch == bp:                                    # static branch: no padded rows
        maskf = None
    else:                                              # ragged tail: build the full-width
        row = jax.lax.broadcasted_iota(jnp.int32, (bp, 1), 0)   # mask once, reuse
        maskf = (row < batch).astype(jnp.float32) * jnp.ones((1, LANE), jnp.float32)

    def leaky(x):                                      # 1 vmul + 1 vmax, no cmp/select
        return jnp.maximum(x, SLOPE * x)

    def linear(x, wi, bi):
        # bf16 operands -> native MXU throughput; f32 accumulation; f32 bias add.
        return jnp.dot(x.astype(jnp.bfloat16), w_ref[wi],
                       preferred_element_type=jnp.float32) + vrow(bi)

    def bn(x, gi, bi):
        # training-mode BatchNorm: single reduction sweep, folded to one affine.
        xm = x if maskf is None else x * maskf
        s = jnp.sum(xm, axis=0, keepdims=True)                  # (1,128)
        sq = jnp.sum(xm * xm, axis=0, keepdims=True)            # (1,128)
        mean = s * inv_b
        var = jnp.maximum(sq * inv_b - mean * mean, 0.0)        # guard fp cancellation
        scale = jax.lax.rsqrt(var + EPS) * vrow(gi)             # (1,128) scalar-row math
        shift = vrow(bi) - mean * scale
        return x * scale + shift                                # 1 vmul + 1 vadd full-width

    def encode(x):                                     # one hand's encoder pass
        x = bn(leaky(linear(x, W_ENC0, V_ENC_B0)), V_BN_G0, V_BN_B0)
        x = bn(leaky(linear(x, W_ENC1, V_ENC_B1)), V_BN_G1, V_BN_B1)
        x = bn(leaky(linear(x, W_ENC2, V_ENC_B2)), V_BN_G2, V_BN_B2)
        return linear(x, W_ENC3, V_ENC_B3)             # lanes 0..7 valid, lanes 8..127 == 0

    e1 = encode(h1_ref[...])
    e2 = encode(h2_ref[...])

    # ---- comparison head ----
    # concat([e1, e2], axis=1) == e1 + roll(e2, 8): lanes 8.. of both embeddings are
    # exactly zero (zero weight/bias padding), so the concat-layer collapses into ONE
    # 128x128 MXU dispatch against the padded cmp_w0.
    cat = e1 + pltpu.roll(e2, shift=EMB_DIM, axis=1)   # emb1 @ lanes 0-7, emb2 @ lanes 8-15
    c = leaky(linear(cat, W_CMP0, V_CMP_B0))
    c = leaky(linear(c, W_CMP1, V_CMP_B1))
    diff = linear(c, W_CMP2, V_CMP_B2)                 # diff value in lane 0, rest 0

    # ---- pack everything into one lane-dense output block ----
    # emb1 -> lanes 0-7, emb2 -> lanes 8-15 (already in `cat`), diff -> lane 16.
    out_ref[...] = cat + pltpu.roll(diff, shift=2 * EMB_DIM, axis=1)


# ---------------------------------------------------------------------------
# Parameter setup (deterministic, synthetic) and packing helpers.
# ---------------------------------------------------------------------------
def init_params(key):
    """Unpadded parameters, weights stored as [in, out]."""
    dims_enc = [(INPUT_SIZE, 128), (128, 64), (64, 32), (32, EMB_DIM)]
    dims_cmp = [(2 * EMB_DIM, HIDDEN_DIM), (HIDDEN_DIM, HIDDEN_DIM // 2),
                (HIDDEN_DIM // 2, 1)]
    p = {}
    keys = jax.random.split(key, len(dims_enc) + len(dims_cmp))
    for i, (fi, fo) in enumerate(dims_enc):
        bound = 1.0 / np.sqrt(fi)
        p[f"enc_w{i}"] = jax.random.uniform(keys[i], (fi, fo), jnp.float32, -bound, bound)
        p[f"enc_b{i}"] = jnp.zeros((fo,), jnp.float32) + 0.01 * (i + 1)
    for i in range(3):  # BN params for first 3 encoder layers
        fo = dims_enc[i][1]
        p[f"bn_g{i}"] = jnp.ones((fo,), jnp.float32)
        p[f"bn_b{i}"] = jnp.zeros((fo,), jnp.float32)
    for i, (fi, fo) in enumerate(dims_cmp):
        bound = 1.0 / np.sqrt(fi)
        p[f"cmp_w{i}"] = jax.random.uniform(keys[len(dims_enc) + i], (fi, fo),
                                            jnp.float32, -bound, bound)
        p[f"cmp_b{i}"] = jnp.zeros((fo,), jnp.float32) - 0.02 * (i + 1)
    return p


def _pad2(x, rows, cols):
    out = jnp.zeros((rows, cols), jnp.float32)
    return out.at[:x.shape[0], :x.shape[1]].set(x)


def pack_params(p):
    """One-time packing of every parameter into two dense stacks (2 DMAs total).

    NOTE: the zero padding of enc_w3 / enc_b3 / cmp_w2 / cmp_b2 is what makes the
    roll-based concat/diff fusion exact — preserve it if this layout changes.
    """
    w_stack = jnp.stack([
        _pad2(p["enc_w0"], LANE, LANE),
        _pad2(p["enc_w1"], LANE, LANE),
        _pad2(p["enc_w2"], LANE, LANE),
        _pad2(p["enc_w3"], LANE, LANE),
        _pad2(p["cmp_w0"], LANE, LANE),   # rows 0-7 act on emb1, rows 8-15 on emb2
        _pad2(p["cmp_w1"], LANE, LANE),
        _pad2(p["cmp_w2"], LANE, LANE),
    ]).astype(jnp.bfloat16)               # MXU-native dtype, half the weight DMA bytes
    vec_list = [p["enc_b0"], p["bn_g0"], p["bn_b0"],
                p["enc_b1"], p["bn_g1"], p["bn_b1"],
                p["enc_b2"], p["bn_g2"], p["bn_b2"],
                p["enc_b3"], p["cmp_b0"], p["cmp_b1"], p["cmp_b2"]]
    v_stack = jnp.zeros((N_VECS, LANE), jnp.float32)
    for i, v in enumerate(vec_list):
        v_stack = v_stack.at[i, :v.shape[0]].set(v)
    return w_stack, v_stack


def _vmem_limit_bytes(bp):
    """Scoped-VMEM request when the padded batch outgrows the default limit."""
    h_bytes = 2 * bp * LANE * 2            # two bf16 hand blocks
    out_bytes = bp * LANE * 4              # packed f32 output block
    w_bytes = 7 * LANE * LANE * 2          # bf16 weight stack
    act_bytes = bp * LANE * 4              # one live f32 activation
    est = 2 * (h_bytes + out_bytes) + 2 * w_bytes + 10 * act_bytes + (1 << 20)
    if est <= 12 * (1 << 20):
        return None                        # default scoped limit (16/32 MiB) is plenty
    return min(est, 48 << 20)              # keep headroom under v7x's 64 MiB physical VMEM


# ---------------------------------------------------------------------------
# Jitted wrapper: pad hands (bf16), one pallas_call, slice the packed output.
# ---------------------------------------------------------------------------
@jax.jit
def equity_diff_forward(hand1, hand2, w_stack, v_stack):
    B = hand1.shape[0]
    Bp = ((B + ROW_ALIGN - 1) // ROW_ALIGN) * ROW_ALIGN

    def pad_hand(h):
        out = jnp.zeros((Bp, LANE), jnp.bfloat16)
        return out.at[:B, :INPUT_SIZE].set(h.astype(jnp.bfloat16))

    h1 = pad_hand(hand1)
    h2 = pad_hand(hand2)

    limit = _vmem_limit_bytes(Bp)
    if limit is None:
        cparams = pltpu.CompilerParams(dimension_semantics=("arbitrary",))
    else:
        cparams = pltpu.CompilerParams(dimension_semantics=("arbitrary",),
                                       vmem_limit_bytes=limit)

    packed = pl.pallas_call(
        functools.partial(_equity_kernel, batch=B),
        grid=(1,),
        in_specs=[pl.BlockSpec((Bp, LANE), lambda i: (0, 0)),
                  pl.BlockSpec((Bp, LANE), lambda i: (0, 0)),
                  pl.BlockSpec((7, LANE, LANE), lambda i: (0, 0, 0)),
                  pl.BlockSpec((N_VECS, LANE), lambda i: (0, 0))],
        out_specs=pl.BlockSpec((Bp, LANE), lambda i: (0, 0)),
        out_shape=jax.ShapeDtypeStruct((Bp, LANE), jnp.float32),
        compiler_params=cparams,
    )(h1, h2, w_stack, v_stack)

    emb1 = packed[:B, :EMB_DIM]
    emb2 = packed[:B, EMB_DIM:2 * EMB_DIM]
    diff = packed[:B, 2 * EMB_DIM:2 * EMB_DIM + 1]
    return emb1, emb2, diff


# ---------------------------------------------------------------------------
# Pure-JAX references for correctness checks.
#   matmul_dtype=bf16  -> same math as the kernel (tight tolerance)
#   matmul_dtype=f32   -> original full-precision module math (loose tolerance)
# ---------------------------------------------------------------------------
def reference_forward(hand1, hand2, p, matmul_dtype=jnp.float32):
    def mm(x, w):
        return jnp.dot(x.astype(matmul_dtype), w.astype(matmul_dtype),
                       preferred_element_type=jnp.float32)

    def leaky(x):
        return jnp.where(x >= 0, x, SLOPE * x)

    def bn(x, g, b):
        mean = jnp.mean(x, axis=0, keepdims=True)
        var = jnp.mean((x - mean) ** 2, axis=0, keepdims=True)
        return (x - mean) * jax.lax.rsqrt(var + EPS) * g + b

    def encoder(x):
        h = bn(leaky(mm(x, p["enc_w0"]) + p["enc_b0"]), p["bn_g0"], p["bn_b0"])
        h = bn(leaky(mm(h, p["enc_w1"]) + p["enc_b1"]), p["bn_g1"], p["bn_b1"])
        h = bn(leaky(mm(h, p["enc_w2"]) + p["enc_b2"]), p["bn_g2"], p["bn_b2"])
        return mm(h, p["enc_w3"]) + p["enc_b3"]

    e1, e2 = encoder(hand1), encoder(hand2)
    c = jnp.concatenate([e1, e2], axis=1)
    c = leaky(mm(c, p["cmp_w0"]) + p["cmp_b0"])
    c = leaky(mm(c, p["cmp_w1"]) + p["cmp_b1"])
    diff = mm(c, p["cmp_w2"]) + p["cmp_b2"]
    return e1, e2, diff


if __name__ == "__main__":
    key = jax.random.PRNGKey(0)
    k_h1, k_h2, k_p = jax.random.split(key, 3)

    params = init_params(k_p)
    w_stack, v_stack = pack_params(params)

    for B in (16, 5):   # full 16-row block, and a ragged batch exercising the tail mask
        hand1 = jax.random.normal(k_h1, (B, INPUT_SIZE), jnp.float32)
        hand2 = jax.random.normal(k_h2, (B, INPUT_SIZE), jnp.float32)

        emb1, emb2, diff = equity_diff_forward(hand1, hand2, w_stack, v_stack)
        jax.block_until_ready((emb1, emb2, diff))
        assert emb1.shape == (B, EMB_DIM)
        assert emb2.shape == (B, EMB_DIM)
        assert diff.shape == (B, 1)

        # tight check against a reference using the same bf16-matmul / f32-BN math
        ref_bf16 = reference_forward(hand1, hand2, params, matmul_dtype=jnp.bfloat16)
        for got, want in zip((emb1, emb2, diff), ref_bf16):
            np.testing.assert_allclose(np.asarray(got), np.asarray(want),
                                       rtol=2e-3, atol=2e-3)

        # loose check against the full-f32 module math (bounds bf16 MXU drift)
        ref_f32 = reference_forward(hand1, hand2, params, matmul_dtype=jnp.float32)
        for got, want in zip((emb1, emb2, diff), ref_f32):
            np.testing.assert_allclose(np.asarray(got), np.asarray(want),
                                       rtol=5e-2, atol=5e-2)

    print("KERNEL_OK")
</pallas_src>

<mosaic_0001>
module attributes {stable_mosaic.version = 11 : i64} {
  func.func @_equity_kernel(%arg0: i32, %arg1: memref<16x128xbf16, #tpu.memory_space<vmem>>, %arg2: memref<16x128xbf16, #tpu.memory_space<vmem>>, %arg3: memref<7x128x128xbf16, #tpu.memory_space<vmem>>, %arg4: memref<16x128xf32, #tpu.memory_space<vmem>>, %arg5: memref<16x128xf32, #tpu.memory_space<vmem>>) attributes {dimension_semantics = [#tpu.dimension_semantics<arbitrary>], iteration_bounds = array<i64: 1>, scalar_prefetch = 0 : i64, scratch_operands = 0 : i64, tpu.core_type = #tpu.core_type<tc>, window_params = [{pipeline_mode = #tpu.pipeline_mode<synchronous>, transform_indices = @transform_0, window_bounds = array<i64: 16, 128>}, {pipeline_mode = #tpu.pipeline_mode<synchronous>, transform_indices = @transform_1, window_bounds = array<i64: 16, 128>}, {pipeline_mode = #tpu.pipeline_mode<synchronous>, transform_indices = @transform_2, window_bounds = array<i64: 7, 128, 128>}, {pipeline_mode = #tpu.pipeline_mode<synchronous>, transform_indices = @transform_3, window_bounds = array<i64: 16, 128>}, {pipeline_mode = #tpu.pipeline_mode<synchronous>, transform_indices = @transform_4, window_bounds = array<i64: 16, 128>}]} {
    %c0 = arith.constant 0 : index
    %c0_0 = arith.constant 0 : index
    %0 = vector.load %arg4[%c0, %c0_0] : memref<16x128xf32, #tpu.memory_space<vmem>>, vector<16x128xf32>
    %c0_1 = arith.constant 0 : index
    %c0_2 = arith.constant 0 : index
    %1 = vector.load %arg1[%c0_1, %c0_2] : memref<16x128xbf16, #tpu.memory_space<vmem>>, vector<16x128xbf16>
    %c0_3 = arith.constant 0 : index
    %c0_4 = arith.constant 0 : index
    %c0_5 = arith.constant 0 : index
    %2 = vector.load %arg3[%c0_3, %c0_4, %c0_5] : memref<7x128x128xbf16, #tpu.memory_space<vmem>>, vector<1x128x128xbf16>
    %3 = vector.shape_cast %2 : vector<1x128x128xbf16> to vector<128x128xbf16>
    %cst = arith.constant dense<0.000000e+00> : vector<16x128xf32>
    %4 = tpu.matmul %1, %3, %cst {dimension_numbers = #tpu.dot_dimension_numbers<[1], [0], [0], [1], [0, 0, 1, 1], [], []>} : vector<16x128xbf16>, vector<128x128xbf16>, vector<16x128xf32> -> vector<16x128xf32>
    %5 = vector.extract_strided_slice %0 {offsets = [0, 0], sizes = [1, 128], strides = [1, 1]} : vector<16x128xf32> to vector<1x128xf32>
    %6 = vector.broadcast %5 : vector<1x128xf32> to vector<16x128xf32>
    %7 = arith.addf %4, %6 : vector<16x128xf32>
    %cst_6 = arith.constant 0.00999999977 : f32
    %8 = vector.broadcast %cst_6 : f32 to vector<16x128xf32>
    %9 = arith.mulf %8, %7 : vector<16x128xf32>
    %10 = arith.maximumf %7, %9 : vector<16x128xf32>
    %cst_7 = arith.constant dense<0.000000e+00> : vector<128xf32>
    %11 = vector.multi_reduction <add>, %10, %cst_7 [0] : vector<16x128xf32> to vector<128xf32>
    %12 = vector.shape_cast %11 : vector<128xf32> to vector<1x128xf32>
    %13 = arith.mulf %10, %10 : vector<16x128xf32>
    %cst_8 = arith.constant dense<0.000000e+00> : vector<128xf32>
    %14 = vector.multi_reduction <add>, %13, %cst_8 [0] : vector<16x128xf32> to vector<128xf32>
    %15 = vector.shape_cast %14 : vector<128xf32> to vector<1x128xf32>
    %cst_9 = arith.constant 6.250000e-02 : f32
    %16 = vector.broadcast %cst_9 : f32 to vector<1x128xf32>
    %17 = arith.mulf %12, %16 : vector<1x128xf32>
    %cst_10 = arith.constant 6.250000e-02 : f32
    %18 = vector.broadcast %cst_10 : f32 to vector<1x128xf32>
    %19 = arith.mulf %15, %18 : vector<1x128xf32>
    %20 = arith.mulf %17, %17 : vector<1x128xf32>
    %21 = arith.subf %19, %20 : vector<1x128xf32>
    %cst_11 = arith.constant 0.000000e+00 : f32
    %22 = vector.broadcast %cst_11 : f32 to vector<1x128xf32>
    %23 = arith.maximumf %21, %22 : vector<1x128xf32>
    %cst_12 = arith.constant 9.99999974E-6 : f32
    %24 = vector.broadcast %cst_12 : f32 to vector<1x128xf32>
    %25 = arith.addf %23, %24 : vector<1x128xf32>
    %26 = math.rsqrt %25 : vector<1x128xf32>
    %27 = vector.extract_strided_slice %0 {offsets = [1, 0], sizes = [1, 128], strides = [1, 1]} : vector<16x128xf32> to vector<1x128xf32>
    %28 = arith.mulf %26, %27 : vector<1x128xf32>
    %29 = vector.extract_strided_slice %0 {offsets = [2, 0], sizes = [1, 128], strides = [1, 1]} : vector<16x128xf32> to vector<1x128xf32>
    %30 = arith.mulf %17, %28 : vector<1x128xf32>
    %31 = arith.subf %29, %30 : vector<1x128xf32>
    %32 = vector.broadcast %28 : vector<1x128xf32> to vector<16x128xf32>
    %33 = arith.mulf %10, %32 : vector<16x128xf32>
    %34 = vector.broadcast %31 : vector<1x128xf32> to vector<16x128xf32>
    %35 = arith.addf %33, %34 : vector<16x128xf32>
    %36 = arith.truncf %35 : vector<16x128xf32> to vector<16x128xbf16>
    %c1 = arith.constant 1 : index
    %c0_13 = arith.constant 0 : index
    %c0_14 = arith.constant 0 : index
    %37 = vector.load %arg3[%c1, %c0_13, %c0_14] : memref<7x128x128xbf16, #tpu.memory_space<vmem>>, vector<1x128x128xbf16>
    %38 = vector.shape_cast %37 : vector<1x128x128xbf16> to vector<128x128xbf16>
    %cst_15 = arith.constant dense<0.000000e+00> : vector<16x128xf32>
    %39 = tpu.matmul %36, %38, %cst_15 {dimension_numbers = #tpu.dot_dimension_numbers<[1], [0], [0], [1], [0, 0, 1, 1], [], []>} : vector<16x128xbf16>, vector<128x128xbf16>, vector<16x128xf32> -> vector<16x128xf32>
    %40 = vector.extract_strided_slice %0 {offsets = [3, 0], sizes = [1, 128], strides = [1, 1]} : vector<16x128xf32> to vector<1x128xf32>
    %41 = vector.broadcast %40 : vector<1x128xf32> to vector<16x128xf32>
    %42 = arith.addf %39, %41 : vector<16x128xf32>
    %cst_16 = arith.constant 0.00999999977 : f32
    %43 = vector.broadcast %cst_16 : f32 to vector<16x128xf32>
    %44 = arith.mulf %43, %42 : vector<16x128xf32>
    %45 = arith.maximumf %42, %44 : vector<16x128xf32>
    %cst_17 = arith.constant dense<0.000000e+00> : vector<128xf32>
    %46 = vector.multi_reduction <add>, %45, %cst_17 [0] : vector<16x128xf32> to vector<128xf32>
    %47 = vector.shape_cast %46 : vector<128xf32> to vector<1x128xf32>
    %48 = arith.mulf %45, %45 : vector<16x128xf32>
    %cst_18 = arith.constant dense<0.000000e+00> : vector<128xf32>
    %49 = vector.multi_reduction <add>, %48, %cst_18 [0] : vector<16x128xf32> to vector<128xf32>
    %50 = vector.shape_cast %49 : vector<128xf32> to vector<1x128xf32>
    %cst_19 = arith.constant 6.250000e-02 : f32
    %51 = vector.broadcast %cst_19 : f32 to vector<1x128xf32>
    %52 = arith.mulf %47, %51 : vector<1x128xf32>
    %cst_20 = arith.constant 6.250000e-02 : f32
    %53 = vector.broadcast %cst_20 : f32 to vector<1x128xf32>
    %54 = arith.mulf %50, %53 : vector<1x128xf32>
    %55 = arith.mulf %52, %52 : vector<1x128xf32>
    %56 = arith.subf %54, %55 : vector<1x128xf32>
    %cst_21 = arith.constant 0.000000e+00 : f32
    %57 = vector.broadcast %cst_21 : f32 to vector<1x128xf32>
    %58 = arith.maximumf %56, %57 : vector<1x128xf32>
    %cst_22 = arith.constant 9.99999974E-6 : f32
    %59 = vector.broadcast %cst_22 : f32 to vector<1x128xf32>
    %60 = arith.addf %58, %59 : vector<1x128xf32>
    %61 = math.rsqrt %60 : vector<1x128xf32>
    %62 = vector.extract_strided_slice %0 {offsets = [4, 0], sizes = [1, 128], strides = [1, 1]} : vector<16x128xf32> to vector<1x128xf32>
    %63 = arith.mulf %61, %62 : vector<1x128xf32>
    %64 = vector.extract_strided_slice %0 {offsets = [5, 0], sizes = [1, 128], strides = [1, 1]} : vector<16x128xf32> to vector<1x128xf32>
    %65 = arith.mulf %52, %63 : vector<1x128xf32>
    %66 = arith.subf %64, %65 : vector<1x128xf32>
    %67 = vector.broadcast %63 : vector<1x128xf32> to vector<16x128xf32>
    %68 = arith.mulf %45, %67 : vector<16x128xf32>
    %69 = vector.broadcast %66 : vector<1x128xf32> to vector<16x128xf32>
    %70 = arith.addf %68, %69 : vector<16x128xf32>
    %71 = arith.truncf %70 : vector<16x128xf32> to vector<16x128xbf16>
    %c2 = arith.constant 2 : index
    %c0_23 = arith.constant 0 : index
    %c0_24 = arith.constant 0 : index
    %72 = vector.load %arg3[%c2, %c0_23, %c0_24] : memref<7x128x128xbf16, #tpu.memory_space<vmem>>, vector<1x128x128xbf16>
    %73 = vector.shape_cast %72 : vector<1x128x128xbf16> to vector<128x128xbf16>
    %cst_25 = arith.constant dense<0.000000e+00> : vector<16x128xf32>
    %74 = tpu.matmul %71, %73, %cst_25 {dimension_numbers = #tpu.dot_dimension_numbers<[1], [0], [0], [1], [0, 0, 1, 1], [], []>} : vector<16x128xbf16>, vector<128x128xbf16>, vector<16x128xf32> -> vector<16x128xf32>
    %75 = vector.extract_strided_slice %0 {offsets = [6, 0], sizes = [1, 128], strides = [1, 1]} : vector<16x128xf32> to vector<1x128xf32>
    %76 = vector.broadcast %75 : vector<1x128xf32> to vector<16x128xf32>
    %77 = arith.addf %74, %76 : vector<16x128xf32>
    %cst_26 = arith.constant 0.00999999977 : f32
    %78 = vector.broadcast %cst_26 : f32 to vector<16x128xf32>
    %79 = arith.mulf %78, %77 : vector<16x128xf32>
    %80 = arith.maximumf %77, %79 : vector<16x128xf32>
    %cst_27 = arith.constant dense<0.000000e+00> : vector<128xf32>
    %81 = vector.multi_reduction <add>, %80, %cst_27 [0] : vector<16x128xf32> to vector<128xf32>
    %82 = vector.shape_cast %81 : vector<128xf32> to vector<1x128xf32>
    %83 = arith.mulf %80, %80 : vector<16x128xf32>
    %cst_28 = arith.constant dense<0.000000e+00> : vector<128xf32>
    %84 = vector.multi_reduction <add>, %83, %cst_28 [0] : vector<16x128xf32> to vector<128xf32>
    %85 = vector.shape_cast %84 : vector<128xf32> to vector<1x128xf32>
    %cst_29 = arith.constant 6.250000e-02 : f32
    %86 = vector.broadcast %cst_29 : f32 to vector<1x128xf32>
    %87 = arith.mulf %82, %86 : vector<1x128xf32>
    %cst_30 = arith.constant 6.250000e-02 : f32
    %88 = vector.broadcast %cst_30 : f32 to vector<1x128xf32>
    %89 = arith.mulf %85, %88 : vector<1x128xf32>
    %90 = arith.mulf %87, %87 : vector<1x128xf32>
    %91 = arith.subf %89, %90 : vector<1x128xf32>
    %cst_31 = arith.constant 0.000000e+00 : f32
    %92 = vector.broadcast %cst_31 : f32 to vector<1x128xf32>
    %93 = arith.maximumf %91, %92 : vector<1x128xf32>
    %cst_32 = arith.constant 9.99999974E-6 : f32
    %94 = vector.broadcast %cst_32 : f32 to vector<1x128xf32>
    %95 = arith.addf %93, %94 : vector<1x128xf32>
    %96 = math.rsqrt %95 : vector<1x128xf32>
    %97 = vector.extract_strided_slice %0 {offsets = [7, 0], sizes = [1, 128], strides = [1, 1]} : vector<16x128xf32> to vector<1x128xf32>
    %98 = arith.mulf %96, %97 : vector<1x128xf32>
    %99 = vector.extract_strided_slice %0 {offsets = [8, 0], sizes = [1, 128], strides = [1, 1]} : vector<16x128xf32> to vector<1x128xf32>
    %100 = arith.mulf %87, %98 : vector<1x128xf32>
    %101 = arith.subf %99, %100 : vector<1x128xf32>
    %102 = vector.broadcast %98 : vector<1x128xf32> to vector<16x128xf32>
    %103 = arith.mulf %80, %102 : vector<16x128xf32>
    %104 = vector.broadcast %101 : vector<1x128xf32> to vector<16x128xf32>
    %105 = arith.addf %103, %104 : vector<16x128xf32>
    %106 = arith.truncf %105 : vector<16x128xf32> to vector<16x128xbf16>
    %c3 = arith.constant 3 : index
    %c0_33 = arith.constant 0 : index
    %c0_34 = arith.constant 0 : index
    %107 = vector.load %arg3[%c3, %c0_33, %c0_34] : memref<7x128x128xbf16, #tpu.memory_space<vmem>>, vector<1x128x128xbf16>
    %108 = vector.shape_cast %107 : vector<1x128x128xbf16> to vector<128x128xbf16>
    %cst_35 = arith.constant dense<0.000000e+00> : vector<16x128xf32>
    %109 = tpu.matmul %106, %108, %cst_35 {dimension_numbers = #tpu.dot_dimension_numbers<[1], [0], [0], [1], [0, 0, 1, 1], [], []>} : vector<16x128xbf16>, vector<128x128xbf16>, vector<16x128xf32> -> vector<16x128xf32>
    %110 = vector.extract_strided_slice %0 {offsets = [9, 0], sizes = [1, 128], strides = [1, 1]} : vector<16x128xf32> to vector<1x128xf32>
    %111 = vector.broadcast %110 : vector<1x128xf32> to vector<16x128xf32>
    %112 = arith.addf %109, %111 : vector<16x128xf32>
    %c0_36 = arith.constant 0 : index
    %c0_37 = arith.constant 0 : index
    %113 = vector.load %arg2[%c0_36, %c0_37] : memref<16x128xbf16, #tpu.memory_space<vmem>>, vector<16x128xbf16>
    %c0_38 = arith.constant 0 : index
    %c0_39 = arith.constant 0 : index
    %c0_40 = arith.constant 0 : index
    %114 = vector.load %arg3[%c0_38, %c0_39, %c0_40] : memref<7x128x128xbf16, #tpu.memory_space<vmem>>, vector<1x128x128xbf16>
    %115 = vector.shape_cast %114 : vector<1x128x128xbf16> to vector<128x128xbf16>
    %cst_41 = arith.constant dense<0.000000e+00> : vector<16x128xf32>
    %116 = tpu.matmul %113, %115, %cst_41 {dimension_numbers = #tpu.dot_dimension_numbers<[1], [0], [0], [1], [0, 0, 1, 1], [], []>} : vector<16x128xbf16>, vector<128x128xbf16>, vector<16x128xf32> -> vector<16x128xf32>
    %117 = vector.extract_strided_slice %0 {offsets = [0, 0], sizes = [1, 128], strides = [1, 1]} : vector<16x128xf32> to vector<1x128xf32>
    %118 = vector.broadcast %117 : vector<1x128xf32> to vector<16x128xf32>
    %119 = arith.addf %116, %118 : vector<16x128xf32>
    %cst_42 = arith.constant 0.00999999977 : f32
    %120 = vector.broadcast %cst_42 : f32 to vector<16x128xf32>
    %121 = arith.mulf %120, %119 : vector<16x128xf32>
    %122 = arith.maximumf %119, %121 : vector<16x128xf32>
    %cst_43 = arith.constant dense<0.000000e+00> : vector<128xf32>
    %123 = vector.multi_reduction <add>, %122, %cst_43 [0] : vector<16x128xf32> to vector<128xf32>
    %124 = vector.shape_cast %123 : vector<128xf32> to vector<1x128xf32>
    %125 = arith.mulf %122, %122 : vector<16x128xf32>
    %cst_44 = arith.constant dense<0.000000e+00> : vector<128xf32>
    %126 = vector.multi_reduction <add>, %125, %cst_44 [0] : vector<16x128xf32> to vector<128xf32>
    %127 = vector.shape_cast %126 : vector<128xf32> to vector<1x128xf32>
    %cst_45 = arith.constant 6.250000e-02 : f32
    %128 = vector.broadcast %cst_45 : f32 to vector<1x128xf32>
    %129 = arith.mulf %124, %128 : vector<1x128xf32>
    %cst_46 = arith.constant 6.250000e-02 : f32
    %130 = vector.broadcast %cst_46 : f32 to vector<1x128xf32>
    %131 = arith.mulf %127, %130 : vector<1x128xf32>
    %132 = arith.mulf %129, %129 : vector<1x128xf32>
    %133 = arith.subf %131, %132 : vector<1x128xf32>
    %cst_47 = arith.constant 0.000000e+00 : f32
    %134 = vector.broadcast %cst_47 : f32 to vector<1x128xf32>
    %135 = arith.maximumf %133, %134 : vector<1x128xf32>
    %cst_48 = arith.constant 9.99999974E-6 : f32
    %136 = vector.broadcast %cst_48 : f32 to vector<1x128xf32>
    %137 = arith.addf %135, %136 : vector<1x128xf32>
    %138 = math.rsqrt %137 : vector<1x128xf32>
    %139 = vector.extract_strided_slice %0 {offsets = [1, 0], sizes = [1, 128], strides = [1, 1]} : vector<16x128xf32> to vector<1x128xf32>
    %140 = arith.mulf %138, %139 : vector<1x128xf32>
    %141 = vector.extract_strided_slice %0 {offsets = [2, 0], sizes = [1, 128], strides = [1, 1]} : vector<16x128xf32> to vector<1x128xf32>
    %142 = arith.mulf %129, %140 : vector<1x128xf32>
    %143 = arith.subf %141, %142 : vector<1x128xf32>
    %144 = vector.broadcast %140 : vector<1x128xf32> to vector<16x128xf32>
    %145 = arith.mulf %122, %144 : vector<16x128xf32>
    %146 = vector.broadcast %143 : vector<1x128xf32> to vector<16x128xf32>
    %147 = arith.addf %145, %146 : vector<16x128xf32>
    %148 = arith.truncf %147 : vector<16x128xf32> to vector<16x128xbf16>
    %c1_49 = arith.constant 1 : index
    %c0_50 = arith.constant 0 : index
    %c0_51 = arith.constant 0 : index
    %149 = vector.load %arg3[%c1_49, %c0_50, %c0_51] : memref<7x128x128xbf16, #tpu.memory_space<vmem>>, vector<1x128x128xbf16>
    %150 = vector.shape_cast %149 : vector<1x128x128xbf16> to vector<128x128xbf16>
    %cst_52 = arith.constant dense<0.000000e+00> : vector<16x128xf32>
    %151 = tpu.matmul %148, %150, %cst_52 {dimension_numbers = #tpu.dot_dimension_numbers<[1], [0], [0], [1], [0, 0, 1, 1], [], []>} : vector<16x128xbf16>, vector<128x128xbf16>, vector<16x128xf32> -> vector<16x128xf32>
    %152 = vector.extract_strided_slice %0 {offsets = [3, 0], sizes = [1, 128], strides = [1, 1]} : vector<16x128xf32> to vector<1x128xf32>
    %153 = vector.broadcast %152 : vector<1x128xf32> to vector<16x128xf32>
    %154 = arith.addf %151, %153 : vector<16x128xf32>
    %cst_53 = arith.constant 0.00999999977 : f32
    %155 = vector.broadcast %cst_53 : f32 to vector<16x128xf32>
    %156 = arith.mulf %155, %154 : vector<16x128xf32>
    %157 = arith.maximumf %154, %156 : vector<16x128xf32>
    %cst_54 = arith.constant dense<0.000000e+00> : vector<128xf32>
    %158 = vector.multi_reduction <add>, %157, %cst_54 [0] : vector<16x128xf32> to vector<128xf32>
    %159 = vector.shape_cast %158 : vector<128xf32> to vector<1x128xf32>
    %160 = arith.mulf %157, %157 : vector<16x128xf32>
    %cst_55 = arith.constant dense<0.000000e+00> : vector<128xf32>
    %161 = vector.multi_reduction <add>, %160, %cst_55 [0] : vector<16x128xf32> to vector<128xf32>
    %162 = vector.shape_cast %161 : vector<128xf32> to vector<1x128xf32>
    %cst_56 = arith.constant 6.250000e-02 : f32
    %163 = vector.broadcast %cst_56 : f32 to vector<1x128xf32>
    %164 = arith.mulf %159, %163 : vector<1x128xf32>
    %cst_57 = arith.constant 6.250000e-02 : f32
    %165 = vector.broadcast %cst_57 : f32 to vector<1x128xf32>
    %166 = arith.mulf %162, %165 : vector<1x128xf32>
    %167 = arith.mulf %164, %164 : vector<1x128xf32>
    %168 = arith.subf %166, %167 : vector<1x128xf32>
    %cst_58 = arith.constant 0.000000e+00 : f32
    %169 = vector.broadcast %cst_58 : f32 to vector<1x128xf32>
    %170 = arith.maximumf %168, %169 : vector<1x128xf32>
    %cst_59 = arith.constant 9.99999974E-6 : f32
    %171 = vector.broadcast %cst_59 : f32 to vector<1x128xf32>
    %172 = arith.addf %170, %171 : vector<1x128xf32>
    %173 = math.rsqrt %172 : vector<1x128xf32>
    %174 = vector.extract_strided_slice %0 {offsets = [4, 0], sizes = [1, 128], strides = [1, 1]} : vector<16x128xf32> to vector<1x128xf32>
    %175 = arith.mulf %173, %174 : vector<1x128xf32>
    %176 = vector.extract_strided_slice %0 {offsets = [5, 0], sizes = [1, 128], strides = [1, 1]} : vector<16x128xf32> to vector<1x128xf32>
    %177 = arith.mulf %164, %175 : vector<1x128xf32>
    %178 = arith.subf %176, %177 : vector<1x128xf32>
    %179 = vector.broadcast %175 : vector<1x128xf32> to vector<16x128xf32>
    %180 = arith.mulf %157, %179 : vector<16x128xf32>
    %181 = vector.broadcast %178 : vector<1x128xf32> to vector<16x128xf32>
    %182 = arith.addf %180, %181 : vector<16x128xf32>
    %183 = arith.truncf %182 : vector<16x128xf32> to vector<16x128xbf16>
    %c2_60 = arith.constant 2 : index
    %c0_61 = arith.constant 0 : index
    %c0_62 = arith.constant 0 : index
    %184 = vector.load %arg3[%c2_60, %c0_61, %c0_62] : memref<7x128x128xbf16, #tpu.memory_space<vmem>>, vector<1x128x128xbf16>
    %185 = vector.shape_cast %184 : vector<1x128x128xbf16> to vector<128x128xbf16>
    %cst_63 = arith.constant dense<0.000000e+00> : vector<16x128xf32>
    %186 = tpu.matmul %183, %185, %cst_63 {dimension_numbers = #tpu.dot_dimension_numbers<[1], [0], [0], [1], [0, 0, 1, 1], [], []>} : vector<16x128xbf16>, vector<128x128xbf16>, vector<16x128xf32> -> vector<16x128xf32>
    %187 = vector.extract_strided_slice %0 {offsets = [6, 0], sizes = [1, 128], strides = [1, 1]} : vector<16x128xf32> to vector<1x128xf32>
    %188 = vector.broadcast %187 : vector<1x128xf32> to vector<16x128xf32>
    %189 = arith.addf %186, %188 : vector<16x128xf32>
    %cst_64 = arith.constant 0.00999999977 : f32
    %190 = vector.broadcast %cst_64 : f32 to vector<16x128xf32>
    %191 = arith.mulf %190, %189 : vector<16x128xf32>
    %192 = arith.maximumf %189, %191 : vector<16x128xf32>
    %cst_65 = arith.constant dense<0.000000e+00> : vector<128xf32>
    %193 = vector.multi_reduction <add>, %192, %cst_65 [0] : vector<16x128xf32> to vector<128xf32>
    %194 = vector.shape_cast %193 : vector<128xf32> to vector<1x128xf32>
    %195 = arith.mulf %192, %192 : vector<16x128xf32>
    %cst_66 = arith.constant dense<0.000000e+00> : vector<128xf32>
    %196 = vector.multi_reduction <add>, %195, %cst_66 [0] : vector<16x128xf32> to vector<128xf32>
    %197 = vector.shape_cast %196 : vector<128xf32> to vector<1x128xf32>
    %cst_67 = arith.constant 6.250000e-02 : f32
    %198 = vector.broadcast %cst_67 : f32 to vector<1x128xf32>
    %199 = arith.mulf %194, %198 : vector<1x128xf32>
    %cst_68 = arith.constant 6.250000e-02 : f32
    %200 = vector.broadcast %cst_68 : f32 to vector<1x128xf32>
    %201 = arith.mulf %197, %200 : vector<1x128xf32>
    %202 = arith.mulf %199, %199 : vector<1x128xf32>
    %203 = arith.subf %201, %202 : vector<1x128xf32>
    %cst_69 = arith.constant 0.000000e+00 : f32
    %204 = vector.broadcast %cst_69 : f32 to vector<1x128xf32>
    %205 = arith.maximumf %203, %204 : vector<1x128xf32>
    %cst_70 = arith.constant 9.99999974E-6 : f32
    %206 = vector.broadcast %cst_70 : f32 to vector<1x128xf32>
    %207 = arith.addf %205, %206 : vector<1x128xf32>
    %208 = math.rsqrt %207 : vector<1x128xf32>
    %209 = vector.extract_strided_slice %0 {offsets = [7, 0], sizes = [1, 128], strides = [1, 1]} : vector<16x128xf32> to vector<1x128xf32>
    %210 = arith.mulf %208, %209 : vector<1x128xf32>
    %211 = vector.extract_strided_slice %0 {offsets = [8, 0], sizes = [1, 128], strides = [1, 1]} : vector<16x128xf32> to vector<1x128xf32>
    %212 = arith.mulf %199, %210 : vector<1x128xf32>
    %213 = arith.subf %211, %212 : vector<1x128xf32>
    %214 = vector.broadcast %210 : vector<1x128xf32> to vector<16x128xf32>
    %215 = arith.mulf %192, %214 : vector<16x128xf32>
    %216 = vector.broadcast %213 : vector<1x128xf32> to vector<16x128xf32>
    %217 = arith.addf %215, %216 : vector<16x128xf32>
    %218 = arith.truncf %217 : vector<16x128xf32> to vector<16x128xbf16>
    %c3_71 = arith.constant 3 : index
    %c0_72 = arith.constant 0 : index
    %c0_73 = arith.constant 0 : index
    %219 = vector.load %arg3[%c3_71, %c0_72, %c0_73] : memref<7x128x128xbf16, #tpu.memory_space<vmem>>, vector<1x128x128xbf16>
    %220 = vector.shape_cast %219 : vector<1x128x128xbf16> to vector<128x128xbf16>
    %cst_74 = arith.constant dense<0.000000e+00> : vector<16x128xf32>
    %221 = tpu.matmul %218, %220, %cst_74 {dimension_numbers = #tpu.dot_dimension_numbers<[1], [0], [0], [1], [0, 0, 1, 1], [], []>} : vector<16x128xbf16>, vector<128x128xbf16>, vector<16x128xf32> -> vector<16x128xf32>
    %222 = vector.extract_strided_slice %0 {offsets = [9, 0], sizes = [1, 128], strides = [1, 1]} : vector<16x128xf32> to vector<1x128xf32>
    %223 = vector.broadcast %222 : vector<1x128xf32> to vector<16x128xf32>
    %224 = arith.addf %221, %223 : vector<16x128xf32>
    %c8_i32 = arith.constant 8 : i32
    %225 = tpu.dynamic_rotate %224 by %c8_i32 dim 1 : vector<16x128xf32>, i32 -> vector<16x128xf32>
    %226 = arith.addf %112, %225 : vector<16x128xf32>
    %227 = arith.truncf %226 : vector<16x128xf32> to vector<16x128xbf16>
    %c4 = arith.constant 4 : index
    %c0_75 = arith.constant 0 : index
    %c0_76 = arith.constant 0 : index
    %228 = vector.load %arg3[%c4, %c0_75, %c0_76] : memref<7x128x128xbf16, #tpu.memory_space<vmem>>, vector<1x128x128xbf16>
    %229 = vector.shape_cast %228 : vector<1x128x128xbf16> to vector<128x128xbf16>
    %cst_77 = arith.constant dense<0.000000e+00> : vector<16x128xf32>
    %230 = tpu.matmul %227, %229, %cst_77 {dimension_numbers = #tpu.dot_dimension_numbers<[1], [0], [0], [1], [0, 0, 1, 1], [], []>} : vector<16x128xbf16>, vector<128x128xbf16>, vector<16x128xf32> -> vector<16x128xf32>
    %231 = vector.extract_strided_slice %0 {offsets = [10, 0], sizes = [1, 128], strides = [1, 1]} : vector<16x128xf32> to vector<1x128xf32>
    %232 = vector.broadcast %231 : vector<1x128xf32> to vector<16x128xf32>
    %233 = arith.addf %230, %232 : vector<16x128xf32>
    %cst_78 = arith.constant 0.00999999977 : f32
    %234 = vector.broadcast %cst_78 : f32 to vector<16x128xf32>
    %235 = arith.mulf %234, %233 : vector<16x128xf32>
    %236 = arith.maximumf %233, %235 : vector<16x128xf32>
    %237 = arith.truncf %236 : vector<16x128xf32> to vector<16x128xbf16>
    %c5 = arith.constant 5 : index
    %c0_79 = arith.constant 0 : index
    %c0_80 = arith.constant 0 : index
    %238 = vector.load %arg3[%c5, %c0_79, %c0_80] : memref<7x128x128xbf16, #tpu.memory_space<vmem>>, vector<1x128x128xbf16>
    %239 = vector.shape_cast %238 : vector<1x128x128xbf16> to vector<128x128xbf16>
    %cst_81 = arith.constant dense<0.000000e+00> : vector<16x128xf32>
    %240 = tpu.matmul %237, %239, %cst_81 {dimension_numbers = #tpu.dot_dimension_numbers<[1], [0], [0], [1], [0, 0, 1, 1], [], []>} : vector<16x128xbf16>, vector<128x128xbf16>, vector<16x128xf32> -> vector<16x128xf32>
    %241 = vector.extract_strided_slice %0 {offsets = [11, 0], sizes = [1, 128], strides = [1, 1]} : vector<16x128xf32> to vector<1x128xf32>
    %242 = vector.broadcast %241 : vector<1x128xf32> to vector<16x128xf32>
    %243 = arith.addf %240, %242 : vector<16x128xf32>
    %cst_82 = arith.constant 0.00999999977 : f32
    %244 = vector.broadcast %cst_82 : f32 to vector<16x128xf32>
    %245 = arith.mulf %244, %243 : vector<16x128xf32>
    %246 = arith.maximumf %243, %245 : vector<16x128xf32>
    %247 = arith.truncf %246 : vector<16x128xf32> to vector<16x128xbf16>
    %c6 = arith.constant 6 : index
    %c0_83 = arith.constant 0 : index
    %c0_84 = arith.constant 0 : index
    %248 = vector.load %arg3[%c6, %c0_83, %c0_84] : memref<7x128x128xbf16, #tpu.memory_space<vmem>>, vector<1x128x128xbf16>
    %249 = vector.shape_cast %248 : vector<1x128x128xbf16> to vector<128x128xbf16>
    %cst_85 = arith.constant dense<0.000000e+00> : vector<16x128xf32>
    %250 = tpu.matmul %247, %249, %cst_85 {dimension_numbers = #tpu.dot_dimension_numbers<[1], [0], [0], [1], [0, 0, 1, 1], [], []>} : vector<16x128xbf16>, vector<128x128xbf16>, vector<16x128xf32> -> vector<16x128xf32>
    %251 = vector.extract_strided_slice %0 {offsets = [12, 0], sizes = [1, 128], strides = [1, 1]} : vector<16x128xf32> to vector<1x128xf32>
    %252 = vector.broadcast %251 : vector<1x128xf32> to vector<16x128xf32>
    %253 = arith.addf %250, %252 : vector<16x128xf32>
    %c16_i32 = arith.constant 16 : i32
    %254 = tpu.dynamic_rotate %253 by %c16_i32 dim 1 : vector<16x128xf32>, i32 -> vector<16x128xf32>
    %255 = arith.addf %226, %254 : vector<16x128xf32>
    %c0_86 = arith.constant 0 : index
    %c0_87 = arith.constant 0 : index
    %256 = vector.load %arg5[%c0_86, %c0_87] : memref<16x128xf32, #tpu.memory_space<vmem>>, vector<16x128xf32>
    tpu.vector_store %arg5[%c0_86, %c0_87], %255 {strides = array<i32>} : memref<16x128xf32, #tpu.memory_space<vmem>>, vector<16x128xf32>,
    return
  }
  func.func @transform_0(%arg0: i32) -> (i32, i32) {
    %c0_i32 = arith.constant 0 : i32
    %c0_i32_0 = arith.constant 0 : i32
    %c0_i32_1 = arith.constant 0 : i32
    return %c0_i32, %c0_i32_0 : i32, i32
  }
  func.func @transform_1(%arg0: i32) -> (i32, i32) {
    %c0_i32 = arith.constant 0 : i32
    %c0_i32_0 = arith.constant 0 : i32
    %c0_i32_1 = arith.constant 0 : i32
    return %c0_i32, %c0_i32_0 : i32, i32
  }
  func.func @transform_2(%arg0: i32) -> (i32, i32, i32) {
    %c0_i32 = arith.constant 0 : i32
    %c0_i32_0 = arith.constant 0 : i32
    %c0_i32_1 = arith.constant 0 : i32
    %c0_i32_2 = arith.constant 0 : i32
    return %c0_i32, %c0_i32_0, %c0_i32_1 : i32, i32, i32
  }
  func.func @transform_3(%arg0: i32) -> (i32, i32) {
    %c0_i32 = arith.constant 0 : i32
    %c0_i32_0 = arith.constant 0 : i32
    %c0_i32_1 = arith.constant 0 : i32
    return %c0_i32, %c0_i32_0 : i32, i32
  }
  func.func @transform_4(%arg0: i32) -> (i32, i32) {
    %c0_i32 = arith.constant 0 : i32
    %c0_i32_0 = arith.constant 0 : i32
    %c0_i32_1 = arith.constant 0 : i32
    return %c0_i32, %c0_i32_0 : i32, i32
  }
}

</mosaic_0001>

<bundles_post_ra>
// kernel: equity_diff_forward.1
= control target key start
LH: loop header
LB: loop body
LE: loop exit
PB: predicated region body
PF: predicated region fallthrough
CT: control target
= control target key end

     0   :  { %9 = vsyncpa [#allocation3], 0  ;;  %s1765_s15 = smov [#allocation2]   ;;  %s2153_s0 = inlined_call_operand.vmem [shape: bf16[16,128], index: 0, kind: input, shape index: {}]   ;;  %s2154_s1 = inlined_call_operand.vmem [shape: bf16[16,128], index: 1, kind: input, shape index: {}]   ;;  %s2155_s2 = inlined_call_operand.hbm [shape: bf16[7,128,128], index: 2, kind: input, shape index: {}]   ;;  %s2156_s3 = inlined_call_operand.vmem [shape: f32[16,128], index: 3, kind: input, shape index: {}]   ;;  %s2157_s4 = inlined_call_operand.vmem [shape: f32[16,128], index: 4, kind: output, shape index: {}]  }
   0x1   :  { %s19_s16 = sshll.u32 %s1765_s15, 4  ;;  %s20_s16 = int_to_ptr.vmem [resolvable:$true] %s19_s16 }
   0x2   :  { %s1751_s17 = scalar_lea.vmem %s20_s16, 7168  ;;  %p1756_p1 = scmp.lt.s32.totalorder %s20_s16, %s20_s16 }
   0x3   :  { %p1752_p0 = scmp.ne.s32.totalorder %s20_s16, %s1751_s17  ;;  %p1757_p2 = scmp.lt.s32.totalorder %s1751_s17, %s1751_s17 }
   0x5   :  { %p1758_p3 = por %p1757_p2, %p1756_p1 }
   0x7   :  { %p1759_p4 = pnand %p1758_p3, %p1752_p0 }
   0x9   :  { %1762 = shalt.err (!%p1759_p4)
}
   0xa   :  { %s1766_s18 = smov 64   ;;  %s1767_s19 = smov 4  }
   0xb   :  { %25 = dma.hbm_to_vmem [thread:$0]  %s2155_s2, 7168, %s20_s16, [#allocation3], %s1766_s18, %s1766_s18, %s1767_s19  }
   0xc   :  { %1763 = dma.done.wait [#allocation3], 7168  }
   0xd   :  { %1764 = vsyncadd [#allocation3], 4294960128  ;;  %v1768_v0 = vmov 0.0   ;;  %vm1769_vm0 = vmmov 0   ;;  %v1806_v1 = vld [vmem:[#allocation2 + $0x38] sm:$0xff]   ;;  %v1809_v2 = vld [vmem:[#allocation2 + $0x30] sm:$0xff]   ;;  %v52_v18 = vlaneseq }
   0xe   :  { %1446 = vmatprep.subr.bf16.mxu0 %v1768_v0  ;;  %1462 = vmatprep.mubr.msk.bf16.mxu0 %vm1769_vm0, %v1768_v0  ;;  %v1813_v3 = vld [vmem:[#allocation2 + $0x28] sm:$0xff]   ;;  %v1816_v4 = vld [vmem:[#allocation2 + $0x20] sm:$0xff]   ;;  %v1820_v5 = vld [vmem:[#allocation2 + $0x18] sm:$0xff]   ;;  %s1771_s27 = smov 16  }
   0xf   :  { %1466 = vmatprep.subr.bf16.mxu1 %v1768_v0  ;;  %1482 = vmatprep.mubr.msk.bf16.mxu1 %vm1769_vm0, %v1768_v0  ;;  %v1824_v6 = vld [vmem:[#allocation2 + $0x10] sm:$0xff]   ;;  %v1828_v7 = vld [vmem:[#allocation2 + $0x8] sm:$0xff]   ;;  %v1832_v8 = vld [vmem:[#allocation2] sm:$0xff]   ;;  %v1875_v19 = vshrl.u32 %v52_v18, 7 }
  0x10   :  { %1447 = vmatpush3.bf16.msra.mxu0 %v1806_v1  ;;  %v1681_v9 = vld [vmem:[%s2153_s0] sm:$0xff]   ;;  %v1843_v10 = vld [vmem:[#allocation2 + $0x78] sm:$0xff]   ;;  %v1847_v11 = vld [vmem:[#allocation2 + $0x70] sm:$0xff]  }
  0x11   :  { %1448 = vmatprep.subr.bf16.mxu0 %v1768_v0  ;;  %1467 = vmatpush3.bf16.msra.mxu1 %v1843_v10  ;;  %v1851_v12 = vld [vmem:[#allocation2 + $0x68] sm:$0xff]   ;;  %v1855_v13 = vld [vmem:[#allocation2 + $0x60] sm:$0xff]   ;;  %v1859_v14 = vld [vmem:[#allocation2 + $0x58] sm:$0xff]   ;;  %v1878_v20 = vsub.s32 0, %v1875_v19  ;;  %v1893_v57 = vsub.s32 1, %v1875_v19  ;;  %v1897_v61 = vsub.s32 2, %v1875_v19 }
  0x12   :  { %1468 = vmatprep.subr.bf16.mxu1 %v1768_v0  ;;  %v1863_v15 = vld [vmem:[#allocation2 + $0x50] sm:$0xff]   ;;  %v1867_v16 = vld [vmem:[#allocation2 + $0x48] sm:$0xff]   ;;  %v1870_v17 = vld [vmem:[#allocation2 + $0x40] sm:$0xff]  }
  0x13   :  { %v1883_v21 = vld [vmem:[%s2156_s3] sm:$0xff] }
  0x14   :  { %1449 = vmatpush3.bf16.msra.mxu0 %v1809_v2  ;;  %v1887_v22 = vrot.slane %v1883_v21, %v1878_v20 }
  0x15   :  { %1450 = vmatprep.subr.bf16.mxu0 %v1768_v0  ;;  %1469 = vmatpush3.bf16.msra.mxu1 %v1847_v11 }
  0x16   :  { %1470 = vmatprep.subr.bf16.mxu1 %v1768_v0 }
  0x18   :  { %1451 = vmatpush3.bf16.msra.mxu0 %v1813_v3 }
  0x19   :  { %1452 = vmatprep.subr.bf16.mxu0 %v1768_v0  ;;  %1471 = vmatpush3.bf16.msra.mxu1 %v1851_v12 }
  0x1a   :  { %1472 = vmatprep.subr.bf16.mxu1 %v1768_v0 }
  0x1c   :  { %1453 = vmatpush3.bf16.msra.mxu0 %v1816_v4 }
  0x1d   :  { %1454 = vmatprep.subr.bf16.mxu0 %v1768_v0  ;;  %1473 = vmatpush3.bf16.msra.mxu1 %v1855_v13 }
  0x1e   :  { %1474 = vmatprep.subr.bf16.mxu1 %v1768_v0 }
  0x20   :  { %1455 = vmatpush3.bf16.msra.mxu0 %v1820_v5 }
  0x21   :  { %1456 = vmatprep.subr.bf16.mxu0 %v1768_v0  ;;  %1475 = vmatpush3.bf16.msra.mxu1 %v1859_v14 }
  0x22   :  { %1476 = vmatprep.subr.bf16.mxu1 %v1768_v0 }
  0x24   :  { %1457 = vmatpush3.bf16.msra.mxu0 %v1824_v6 }
  0x25   :  { %1458 = vmatprep.subr.bf16.mxu0 %v1768_v0  ;;  %1477 = vmatpush3.bf16.msra.mxu1 %v1863_v15 }
  0x26   :  { %1478 = vmatprep.subr.bf16.mxu1 %v1768_v0 }
  0x28   :  { %1459 = vmatpush3.bf16.msra.mxu0 %v1828_v7 }
  0x29   :  { %1460 = vmatprep.subr.bf16.mxu0 %v1768_v0  ;;  %1479 = vmatpush3.bf16.msra.mxu1 %v1867_v16 }
  0x2a   :  { %1480 = vmatprep.subr.bf16.mxu1 %v1768_v0 }
  0x2c   :  { %1461 = vmatpush3.bf16.msra.mxu0 %v1832_v8 }
  0x2d   :  { %1486 = vmatprep.subr.bf16.mxu0 %v1768_v0  ;;  %1481 = vmatpush3.bf16.msra.mxu1 %v1870_v17 }
  0x2e   :  { %1506 = vmatprep.subr.bf16.mxu1 %v1768_v0 }
  0x2f   :  { %1463 = vmatmul.mubr.bf16.vlgmr.msra.gmra.mxu0 %v1681_v9 }
  0x30   :  { %1502 = vmatprep.mubr.msk.bf16.mxu0 %vm1769_vm0, %v1768_v0 }
  0xef   :  { %v144_v23 = vpop.f32.mrf.mxu0 }
  0xf0   :  { %v145_v24 = vadd.f32 %v144_v23, %v1887_v22 }
  0xf1   :  { %v1464_v25 = vpop.f32.mrf.mxu0 }
  0xf2   :  { %v151_v26 = vmul.f32 0.01, %v145_v24 }
  0xf3   :  { %v147_v27 = vpop.f32.mrf.mxu0 }
  0xf4   :  { %v148_v28 = vadd.f32 %v147_v27, %v1887_v22  ;;  %v153_v30 = vmax.f32 %v145_v24, %v151_v26  ;;  %v1903_v26 = vld [vmem:[#allocation2 + $0xb8] sm:$0xff]   ;;  %v1907_v27 = vld [vmem:[#allocation2 + $0xb0] sm:$0xff]  }
  0xf5   :  { %v1465_v29 = vpop.f32.mrf.mxu0  ;;  %1487 = vmatpush3.bf16.msra.mxu0 %v1903_v26 }
  0xf6   :  { %v152_v31 = vmul.f32 0.01, %v148_v28  ;;  %v162_v33 = vmul.f32 %v153_v30, %v153_v30  ;;  %1488 = vmatprep.subr.bf16.mxu0 %v1768_v0  ;;  %v1915_v29 = vld [vmem:[#allocation2 + $0xa0] sm:$0xff]  }
  0xf8   :  { %v154_v32 = vmax.f32 %v148_v28, %v152_v31  ;;  %v1911_v28 = vld [vmem:[#allocation2 + $0xa8] sm:$0xff]   ;;  %v1923_v31 = vld [vmem:[#allocation2 + $0x90] sm:$0xff]  }
  0xf9   :  { %1489 = vmatpush3.bf16.msra.mxu0 %v1907_v27 }
  0xfa   :  { %v155_v34 = vadd.f32 %v154_v32, %v153_v30  ;;  %v163_v35 = vmul.f32 %v154_v32, %v154_v32  ;;  %1490 = vmatprep.subr.bf16.mxu0 %v1768_v0 }
  0xfc   :  { %v156_v36 = vrot.slane %v155_v34, 4  ;;  %v164_v37 = vadd.f32 %v163_v35, %v162_v33  ;;  %v1931_v33 = vld [vmem:[#allocation2 + $0x80] sm:$0xff]  }
  0xfd   :  { %1491 = vmatpush3.bf16.msra.mxu0 %v1911_v28 }
  0xfe   :  { %v157_v38 = vadd.f32 %v156_v36, %v155_v34  ;;  %v165_v39 = vrot.slane %v164_v37, 4  ;;  %1492 = vmatprep.subr.bf16.mxu0 %v1768_v0  ;;  %v216_v34 = vsub.s32 3, %v1875_v19 }
 0x100   :  { %v158_v40 = vrot.slane %v157_v38, 2  ;;  %v166_v41 = vadd.f32 %v165_v39, %v164_v37  ;;  %v1939_v35 = vrot.slane %v1883_v21, %v216_v34 }
 0x101   :  { %1493 = vmatpush3.bf16.msra.mxu0 %v1915_v29 }
 0x102   :  { %v159_v42 = vadd.f32 %v158_v40, %v157_v38  ;;  %v167_v43 = vrot.slane %v166_v41, 2  ;;  %1494 = vmatprep.subr.bf16.mxu0 %v1768_v0 }
 0x104   :  { %v160_v44 = vrot.slane %v159_v42, 1  ;;  %v168_v45 = vadd.f32 %v167_v43, %v166_v41 }
 0x106   :  { %v161_v46 = vadd.f32 %v160_v44, %v159_v42  ;;  %v169_v47 = vrot.slane %v168_v45, 1 }
 0x108   :  { %v170_v48 = vadd.f32 %v169_v47, %v168_v45  ;;  %v171_v49 = vmul.f32 0.0625, %v161_v46 }
 0x10a   :  { %v172_v50 = vmul.f32 0.0625, %v170_v48  ;;  %v173_v51 = vmul.f32 %v171_v49, %v171_v49 }
 0x10c   :  { %v174_v52 = vsub.f32 %v172_v50, %v173_v51 }
 0x10e   :  { %v175_v53 = vmax.f32 %v174_v52, 0.0 }
 0x110   :  { %v176_v54 = vadd.f32 1e-05, %v175_v53 }
 0x112   :  { %1731 = vrsqrt.f32 %v176_v54 }
 0x11f   :  { %v1732_v55 = vpop.eup %1731 }
 0x120   :  { %v178_v56 = vmul.f32 %v1732_v55, %v1883_v21 }
 0x122   :  { %v179_v58 = vmul.f32 %v178_v56, %v171_v49  ;;  %v187_v59 = vrot.slane %v178_v56, %v1893_v57 }
 0x124   :  { %v181_v60 = vrot.slane %v179_v58, 7  ;;  %v189_v63 = vmul.f32 %v187_v59, %v154_v32  ;;  %v188_v9 = vmul.f32 %v187_v59, %v153_v30  ;;  %v1919_v30 = vld [vmem:[#allocation2 + $0x98] sm:$0xff]   ;;  %v1927_v32 = vld [vmem:[#allocation2 + $0x88] sm:$0xff]  }
 0x125   :  { %1495 = vmatpush3.bf16.msra.mxu0 %v1919_v30 }
 0x126   :  { %v183_v62 = vsub.f32 %v1883_v21, %v181_v60  ;;  %1496 = vmatprep.subr.bf16.mxu0 %v1768_v0 }
 0x128   :  { %v193_v18 = vrot.slane %v183_v62, %v1897_v61 }
 0x129   :  { %1497 = vmatpush3.bf16.msra.mxu0 %v1923_v31 }
 0x12a   :  { %v194_v23 = vadd.f32 %v193_v18, %v188_v9  ;;  %v195_v24 = vadd.f32 %v193_v18, %v189_v63  ;;  %1498 = vmatprep.subr.bf16.mxu0 %v1768_v0 }
 0x12c   :  { %v196_v25 = vpack.c.bf16 %v195_v24, %v194_v23 }
 0x12d   :  { %1499 = vmatpush3.bf16.msra.mxu0 %v1927_v32 }
 0x12e   :  { %1483 = vmatmul.mubr.bf16.vlgmr.msra.gmra.mxu1 %v196_v25  ;;  %1500 = vmatprep.subr.bf16.mxu0 %v1768_v0 }
 0x12f   :  { %1522 = vmatprep.mubr.msk.bf16.mxu1 %vm1769_vm0, %v1768_v0 }
 0x131   :  { %1501 = vmatpush3.bf16.msra.mxu0 %v1931_v33 }
 0x132   :  { %1526 = vmatprep.subr.bf16.mxu0 %v1768_v0 }
 0x1ee   :  { %v300_v36 = vpop.f32.mrf.mxu1 }
 0x1ef   :  { %v301_v37 = vadd.f32 %v300_v36, %v1939_v35 }
 0x1f0   :  { %v1484_v38 = vpop.f32.mrf.mxu1 }
 0x1f1   :  { %v307_v39 = vmul.f32 0.01, %v301_v37 }
 0x1f2   :  { %v303_v40 = vpop.f32.mrf.mxu1 }
 0x1f3   :  { %v304_v41 = vadd.f32 %v303_v40, %v1939_v35  ;;  %v309_v43 = vmax.f32 %v301_v37, %v307_v39  ;;  %v1945_v39 = vsub.s32 4, %v1875_v19 }
 0x1f4   :  { %v1485_v42 = vpop.f32.mrf.mxu1 }
 0x1f5   :  { %v308_v44 = vmul.f32 0.01, %v304_v41  ;;  %v318_v46 = vmul.f32 %v309_v43, %v309_v43 }
 0x1f7   :  { %v310_v45 = vmax.f32 %v304_v41, %v308_v44  ;;  %v348_v44 = vsub.s32 5, %v1875_v19 }
 0x1f9   :  { %v311_v47 = vadd.f32 %v310_v45, %v309_v43  ;;  %v319_v48 = vmul.f32 %v310_v45, %v310_v45 }
 0x1fb   :  { %v312_v49 = vrot.slane %v311_v47, 4  ;;  %v320_v50 = vadd.f32 %v319_v48, %v318_v46 }
 0x1fd   :  { %v313_v51 = vadd.f32 %v312_v49, %v311_v47  ;;  %v321_v52 = vrot.slane %v320_v50, 4 }
 0x1ff   :  { %v314_v53 = vrot.slane %v313_v51, 2  ;;  %v322_v54 = vadd.f32 %v321_v52, %v320_v50 }
 0x201   :  { %v315_v55 = vadd.f32 %v314_v53, %v313_v51  ;;  %v323_v56 = vrot.slane %v322_v54, 2 }
 0x203   :  { %v316_v58 = vrot.slane %v315_v55, 1  ;;  %v324_v59 = vadd.f32 %v323_v56, %v322_v54 }
 0x205   :  { %v317_v60 = vadd.f32 %v316_v58, %v315_v55  ;;  %v325_v62 = vrot.slane %v324_v59, 1 }
 0x207   :  { %v326_v63 = vadd.f32 %v325_v62, %v324_v59  ;;  %v327_v9 = vmul.f32 0.0625, %v317_v60 }
 0x209   :  { %v328_v18 = vmul.f32 0.0625, %v326_v63  ;;  %v329_v23 = vmul.f32 %v327_v9, %v327_v9 }
 0x20b   :  { %v330_v24 = vsub.f32 %v328_v18, %v329_v23 }
 0x20d   :  { %v331_v25 = vmax.f32 %v330_v24, 0.0 }
 0x20f   :  { %v332_v36 = vadd.f32 1e-05, %v331_v25 }
 0x211   :  { %1733 = vrsqrt.f32 %v332_v36 }
 0x21e   :  { %v1734_v37 = vpop.eup %1733 }
 0x21f   :  { %v334_v38 = vmul.f32 %v1734_v37, %v1883_v21 }
 0x221   :  { %v335_v40 = vmul.f32 %v334_v38, %v327_v9  ;;  %v343_v42 = vrot.slane %v334_v38, %v1945_v39 }
 0x223   :  { %v337_v41 = vrot.slane %v335_v40, 7  ;;  %v344_v47 = vmul.f32 %v343_v42, %v309_v43  ;;  %v345_v48 = vmul.f32 %v343_v42, %v310_v45 }
 0x225   :  { %v339_v46 = vsub.f32 %v1883_v21, %v337_v41 }
 0x227   :  { %v349_v49 = vrot.slane %v339_v46, %v348_v44 }
 0x229   :  { %v351_v50 = vadd.f32 %v349_v49, %v345_v48  ;;  %v350_v51 = vadd.f32 %v349_v49, %v344_v47 }
 0x22b   :  { %v352_v52 = vpack.c.bf16 %v351_v50, %v350_v51 }
 0x22d   :  { %1503 = vmatmul.mubr.bf16.vlgmr.msra.gmra.mxu0 %v352_v52 }
 0x22e   :  { %1527 = vmatpush3.bf16.msra.mxu0 %v1806_v1  ;;  %1542 = vmatprep.mubr.msk.bf16.mxu0 %vm1769_vm0, %v1768_v0  ;;  %v1698_v1 = vld [vmem:[%s2154_s1] sm:$0xff]  }
 0x22f   :  { %1528 = vmatprep.subr.bf16.mxu0 %v1768_v0 }
 0x232   :  { %1529 = vmatpush3.bf16.msra.mxu0 %v1809_v2  ;;  %v1991_v2 = vld [vmem:[#allocation2 + $0xf8] sm:$0xff]  }
 0x233   :  { %1530 = vmatprep.subr.bf16.mxu0 %v1768_v0  ;;  %1507 = vmatpush3.bf16.msra.mxu1 %v1991_v2 }
 0x234   :  { %1508 = vmatprep.subr.bf16.mxu1 %v1768_v0 }
 0x236   :  { %1531 = vmatpush3.bf16.msra.mxu0 %v1813_v3  ;;  %v1995_v3 = vld [vmem:[#allocation2 + $0xf0] sm:$0xff]  }
 0x237   :  { %1532 = vmatprep.subr.bf16.mxu0 %v1768_v0  ;;  %1509 = vmatpush3.bf16.msra.mxu1 %v1995_v3 }
 0x238   :  { %1510 = vmatprep.subr.bf16.mxu1 %v1768_v0 }
 0x23a   :  { %1533 = vmatpush3.bf16.msra.mxu0 %v1816_v4  ;;  %v1999_v4 = vld [vmem:[#allocation2 + $0xe8] sm:$0xff]  }
 0x23b   :  { %1534 = vmatprep.subr.bf16.mxu0 %v1768_v0  ;;  %1511 = vmatpush3.bf16.msra.mxu1 %v1999_v4 }
 0x23c   :  { %1512 = vmatprep.subr.bf16.mxu1 %v1768_v0 }
 0x23e   :  { %1535 = vmatpush3.bf16.msra.mxu0 %v1820_v5  ;;  %v2003_v5 = vld [vmem:[#allocation2 + $0xe0] sm:$0xff]  }
 0x23f   :  { %1536 = vmatprep.subr.bf16.mxu0 %v1768_v0  ;;  %1513 = vmatpush3.bf16.msra.mxu1 %v2003_v5 }
 0x240   :  { %1514 = vmatprep.subr.bf16.mxu1 %v1768_v0 }
 0x242   :  { %1537 = vmatpush3.bf16.msra.mxu0 %v1824_v6  ;;  %v2007_v6 = vld [vmem:[#allocation2 + $0xd8] sm:$0xff]  }
 0x243   :  { %1538 = vmatprep.subr.bf16.mxu0 %v1768_v0  ;;  %1515 = vmatpush3.bf16.msra.mxu1 %v2007_v6 }
 0x244   :  { %1516 = vmatprep.subr.bf16.mxu1 %v1768_v0 }
 0x246   :  { %1539 = vmatpush3.bf16.msra.mxu0 %v1828_v7  ;;  %v2011_v7 = vld [vmem:[#allocation2 + $0xd0] sm:$0xff]  }
 0x247   :  { %1540 = vmatprep.subr.bf16.mxu0 %v1768_v0  ;;  %1517 = vmatpush3.bf16.msra.mxu1 %v2011_v7 }
 0x248   :  { %1518 = vmatprep.subr.bf16.mxu1 %v1768_v0 }
 0x24a   :  { %1541 = vmatpush3.bf16.msra.mxu0 %v1832_v8  ;;  %v2015_v8 = vld [vmem:[#allocation2 + $0xc8] sm:$0xff]  }
 0x24b   :  { %1566 = vmatprep.subr.bf16.mxu0 %v1768_v0  ;;  %1519 = vmatpush3.bf16.msra.mxu1 %v2015_v8 }
 0x24c   :  { %1520 = vmatprep.subr.bf16.mxu1 %v1768_v0 }
 0x24d   :  { %1543 = vmatmul.mubr.bf16.vlgmr.msra.gmra.mxu0 %v1698_v1 }
 0x24e   :  { %1567 = vmatpush3.bf16.msra.mxu0 %v1903_v26  ;;  %1582 = vmatprep.mubr.msk.bf16.mxu0 %vm1769_vm0, %v1768_v0  ;;  %v2019_v26 = vld [vmem:[#allocation2 + $0xc0] sm:$0xff]  }
 0x24f   :  { %1568 = vmatprep.subr.bf16.mxu0 %v1768_v0  ;;  %1521 = vmatpush3.bf16.msra.mxu1 %v2019_v26 }
 0x250   :  { %1546 = vmatprep.subr.bf16.mxu1 %v1768_v0 }
 0x252   :  { %1569 = vmatpush3.bf16.msra.mxu0 %v1907_v27  ;;  %v372_v27 = vsub.s32 6, %v1875_v19 }
 0x253   :  { %1570 = vmatprep.subr.bf16.mxu0 %v1768_v0 }
 0x256   :  { %1571 = vmatpush3.bf16.msra.mxu0 %v1911_v28  ;;  %v2025_v28 = vrot.slane %v1883_v21, %v372_v27 }
 0x257   :  { %1572 = vmatprep.subr.bf16.mxu0 %v1768_v0 }
 0x25a   :  { %1573 = vmatpush3.bf16.msra.mxu0 %v1915_v29 }
 0x25b   :  { %1574 = vmatprep.subr.bf16.mxu0 %v1768_v0 }
 0x25e   :  { %1575 = vmatpush3.bf16.msra.mxu0 %v1919_v30 }
 0x25f   :  { %1576 = vmatprep.subr.bf16.mxu0 %v1768_v0 }
 0x262   :  { %1577 = vmatpush3.bf16.msra.mxu0 %v1923_v31 }
 0x263   :  { %1578 = vmatprep.subr.bf16.mxu0 %v1768_v0 }
 0x266   :  { %1579 = vmatpush3.bf16.msra.mxu0 %v1927_v32 }
 0x267   :  { %1580 = vmatprep.subr.bf16.mxu0 %v1768_v0 }
 0x26a   :  { %1581 = vmatpush3.bf16.msra.mxu0 %v1931_v33 }
 0x26b   :  { %1606 = vmatprep.subr.bf16.mxu0 %v1768_v0 }
 0x2ed   :  { %v456_v29 = vpop.f32.mrf.mxu0 }
 0x2ee   :  { %v457_v30 = vadd.f32 %v456_v29, %v2025_v28 }
 0x2ef   :  { %v1504_v31 = vpop.f32.mrf.mxu0 }
 0x2f0   :  { %v463_v32 = vmul.f32 0.01, %v457_v30 }
 0x2f1   :  { %v459_v33 = vpop.f32.mrf.mxu0 }
 0x2f2   :  { %v460_v43 = vadd.f32 %v459_v33, %v2025_v28  ;;  %v465_v53 = vmax.f32 %v457_v30, %v463_v32 }
 0x2f3   :  { %v1505_v45 = vpop.f32.mrf.mxu0 }
 0x2f4   :  { %v464_v54 = vmul.f32 0.01, %v460_v43  ;;  %v474_v56 = vmul.f32 %v465_v53, %v465_v53 }
 0x2f6   :  { %v466_v55 = vmax.f32 %v460_v43, %v464_v54 }
 0x2f8   :  { %v467_v58 = vadd.f32 %v466_v55, %v465_v53  ;;  %v475_v59 = vmul.f32 %v466_v55, %v466_v55 }
 0x2fa   :  { %v468_v60 = vrot.slane %v467_v58, 4  ;;  %v476_v62 = vadd.f32 %v475_v59, %v474_v56 }
 0x2fc   :  { %v469_v63 = vadd.f32 %v468_v60, %v467_v58  ;;  %v477_v9 = vrot.slane %v476_v62, 4 }
 0x2fe   :  { %v470_v18 = vrot.slane %v469_v63, 2  ;;  %v478_v23 = vadd.f32 %v477_v9, %v476_v62 }
 0x300   :  { %v471_v24 = vadd.f32 %v470_v18, %v469_v63  ;;  %v479_v25 = vrot.slane %v478_v23, 2  ;;  %v498_v18 = vsub.s32 7, %v1875_v19 }
 0x302   :  { %v472_v36 = vrot.slane %v471_v24, 1  ;;  %v480_v37 = vadd.f32 %v479_v25, %v478_v23 }
 0x304   :  { %v473_v38 = vadd.f32 %v472_v36, %v471_v24  ;;  %v481_v40 = vrot.slane %v480_v37, 1 }
 0x306   :  { %v482_v41 = vadd.f32 %v481_v40, %v480_v37  ;;  %v483_v42 = vmul.f32 0.0625, %v473_v38  ;;  %v2036_v37 = vld [vmem:[%s2156_s3 + $0x8] sm:$0xff]  ;;  %s1770_s3 = smov 8  }
 0x308   :  { %v484_v46 = vmul.f32 0.0625, %v482_v41  ;;  %v485_v47 = vmul.f32 %v483_v42, %v483_v42 }
 0x30a   :  { %v486_v48 = vsub.f32 %v484_v46, %v485_v47 }
 0x30c   :  { %v487_v49 = vmax.f32 %v486_v48, 0.0 }
 0x30d   :  { %v661_v50 = vpop.f32.mrf.mxu0 }
 0x30e   :  { %v488_v51 = vadd.f32 1e-05, %v487_v49  ;;  %v662_v52 = vadd.f32 %v661_v50, %v1887_v22 }
 0x30f   :  { %v1544_v1 = vpop.f32.mrf.mxu0 }
 0x310   :  { %1735 = vrsqrt.f32 %v488_v51  ;;  %v668_v27 = vmul.f32 0.01, %v662_v52 }
 0x311   :  { %v664_v29 = vpop.f32.mrf.mxu0 }
 0x312   :  { %v665_v30 = vadd.f32 %v664_v29, %v1887_v22  ;;  %v670_v32 = vmax.f32 %v662_v52, %v668_v27 }
 0x313   :  { %v1545_v31 = vpop.f32.mrf.mxu0 }
 0x314   :  { %v669_v33 = vmul.f32 0.01, %v665_v30  ;;  %v679_v45 = vmul.f32 %v670_v32, %v670_v32 }
 0x316   :  { %v671_v43 = vmax.f32 %v665_v30, %v669_v33 }
 0x318   :  { %v672_v54 = vadd.f32 %v671_v43, %v670_v32  ;;  %v680_v56 = vmul.f32 %v671_v43, %v671_v43 }
 0x31a   :  { %v673_v58 = vrot.slane %v672_v54, 4  ;;  %v681_v59 = vadd.f32 %v680_v56, %v679_v45 }
 0x31c   :  { %v674_v60 = vadd.f32 %v673_v58, %v672_v54  ;;  %v682_v62 = vrot.slane %v681_v59, 4 }
 0x31d   :  { %v1736_v63 = vpop.eup %1735 }
 0x31e   :  { %v490_v9 = vmul.f32 %v1736_v63, %v1883_v21  ;;  %v675_v23 = vrot.slane %v674_v60, 2  ;;  %v683_v24 = vadd.f32 %v682_v62, %v681_v59 }
 0x320   :  { %v491_v25 = vmul.f32 %v490_v9, %v483_v42  ;;  %v676_v22 = vadd.f32 %v675_v23, %v674_v60  ;;  %v684_v36 = vrot.slane %v683_v24, 2  ;;  %v499_v40 = vrot.slane %v490_v9, %v498_v18 }
 0x322   :  { %v493_v38 = vrot.slane %v491_v25, 7  ;;  %v677_v41 = vrot.slane %v676_v22, 1  ;;  %v685_v46 = vadd.f32 %v684_v36, %v683_v24  ;;  %v500_v50 = vmul.f32 %v499_v40, %v465_v53 }
 0x323   :  { %v501_v51 = vmul.f32 %v499_v40, %v466_v55 }
 0x324   :  { %v495_v47 = vsub.f32 %v2036_v37, %v493_v38  ;;  %v678_v48 = vadd.f32 %v677_v41, %v676_v22  ;;  %v686_v49 = vrot.slane %v685_v46, 1 }
 0x326   :  { %v505_v42 = vrot.slane %v495_v47, %v1878_v20  ;;  %v688_v52 = vmul.f32 0.0625, %v678_v48  ;;  %v687_v1 = vadd.f32 %v686_v49, %v685_v46 }
 0x328   :  { %v507_v27 = vadd.f32 %v505_v42, %v501_v51  ;;  %v690_v29 = vmul.f32 %v688_v52, %v688_v52  ;;  %v506_v30 = vadd.f32 %v505_v42, %v500_v50  ;;  %v689_v31 = vmul.f32 0.0625, %v687_v1 }
 0x32a   :  { %v508_v33 = vpack.c.bf16 %v507_v27, %v506_v30  ;;  %v691_v45 = vsub.f32 %v689_v31, %v690_v29 }
 0x32c   :  { %1523 = vmatmul.mubr.bf16.vlgmr.msra.gmra.mxu1 %v508_v33  ;;  %v692_v54 = vmax.f32 %v691_v45, 0.0 }
 0x32d   :  { %1547 = vmatpush3.bf16.msra.mxu1 %v1843_v10  ;;  %1562 = vmatprep.mubr.msk.bf16.mxu1 %vm1769_vm0, %v1768_v0 }
 0x32e   :  { %1548 = vmatprep.subr.bf16.mxu1 %v1768_v0  ;;  %v693_v53 = vadd.f32 1e-05, %v692_v54 }
 0x330   :  { %1737 = vrsqrt.f32 %v693_v53 }
 0x331   :  { %1549 = vmatpush3.bf16.msra.mxu1 %v1847_v11 }
 0x332   :  { %1550 = vmatprep.subr.bf16.mxu1 %v1768_v0 }
 0x335   :  { %1551 = vmatpush3.bf16.msra.mxu1 %v1851_v12 }
 0x336   :  { %1552 = vmatprep.subr.bf16.mxu1 %v1768_v0 }
 0x339   :  { %1553 = vmatpush3.bf16.msra.mxu1 %v1855_v13 }
 0x33a   :  { %1554 = vmatprep.subr.bf16.mxu1 %v1768_v0 }
 0x33d   :  { %1555 = vmatpush3.bf16.msra.mxu1 %v1859_v14  ;;  %v1738_v10 = vpop.eup %1737 }
 0x33e   :  { %1556 = vmatprep.subr.bf16.mxu1 %v1768_v0  ;;  %v695_v55 = vmul.f32 %v1738_v10, %v1883_v21 }
 0x340   :  { %v696_v56 = vmul.f32 %v695_v55, %v688_v52  ;;  %v704_v12 = vrot.slane %v695_v55, %v1893_v57 }
 0x341   :  { %1557 = vmatpush3.bf16.msra.mxu1 %v1863_v15 }
 0x342   :  { %1558 = vmatprep.subr.bf16.mxu1 %v1768_v0  ;;  %v698_v11 = vrot.slane %v696_v56, 7  ;;  %v705_v13 = vmul.f32 %v704_v12, %v670_v32  ;;  %v706_v14 = vmul.f32 %v704_v12, %v671_v43 }
 0x344   :  { %v700_v58 = vsub.f32 %v1883_v21, %v698_v11 }
 0x345   :  { %1559 = vmatpush3.bf16.msra.mxu1 %v1867_v16 }
 0x346   :  { %1560 = vmatprep.subr.bf16.mxu1 %v1768_v0  ;;  %v710_v59 = vrot.slane %v700_v58, %v1897_v61 }
 0x348   :  { %v712_v60 = vadd.f32 %v710_v59, %v706_v14  ;;  %v711_v62 = vadd.f32 %v710_v59, %v705_v13 }
 0x349   :  { %1561 = vmatpush3.bf16.msra.mxu1 %v1870_v17 }
 0x34a   :  { %1586 = vmatprep.subr.bf16.mxu1 %v1768_v0  ;;  %v713_v15 = vpack.c.bf16 %v712_v60, %v711_v62 }
 0x34c   :  { %1563 = vmatmul.mubr.bf16.vlgmr.msra.gmra.mxu1 %v713_v15 }
 0x34d   :  { %1587 = vmatpush3.bf16.msra.mxu1 %v1991_v2  ;;  %1602 = vmatprep.mubr.msk.bf16.mxu1 %vm1769_vm0, %v1768_v0 }
 0x34e   :  { %1588 = vmatprep.subr.bf16.mxu1 %v1768_v0 }
 0x351   :  { %1589 = vmatpush3.bf16.msra.mxu1 %v1995_v3 }
 0x352   :  { %1590 = vmatprep.subr.bf16.mxu1 %v1768_v0 }
 0x355   :  { %1591 = vmatpush3.bf16.msra.mxu1 %v1999_v4 }
 0x356   :  { %1592 = vmatprep.subr.bf16.mxu1 %v1768_v0 }
 0x359   :  { %1593 = vmatpush3.bf16.msra.mxu1 %v2003_v5 }
 0x35a   :  { %1594 = vmatprep.subr.bf16.mxu1 %v1768_v0 }
 0x35d   :  { %1595 = vmatpush3.bf16.msra.mxu1 %v2007_v6 }
 0x35e   :  { %1596 = vmatprep.subr.bf16.mxu1 %v1768_v0 }
 0x361   :  { %1597 = vmatpush3.bf16.msra.mxu1 %v2011_v7 }
 0x362   :  { %1598 = vmatprep.subr.bf16.mxu1 %v1768_v0 }
 0x365   :  { %1599 = vmatpush3.bf16.msra.mxu1 %v2015_v8 }
 0x366   :  { %1600 = vmatprep.subr.bf16.mxu1 %v1768_v0 }
 0x369   :  { %1601 = vmatpush3.bf16.msra.mxu1 %v2019_v26 }
 0x36a   :  { %1626 = vmatprep.subr.bf16.mxu1 %v1768_v0 }
 0x3ec   :  { %v2082_v16 = vpop.f32.mrf.mxu1 }
 0x3ee   :  { %v1524_v17 = vpop.f32.mrf.mxu1 }
 0x3f0   :  { %v2084_v2 = vpop.f32.mrf.mxu1 }
 0x3f2   :  { %v1525_v3 = vpop.f32.mrf.mxu1 }
 0x40c   :  { %v748_v4 = vpop.f32.mrf.mxu1 }
 0x40d   :  { %v749_v5 = vadd.f32 %v748_v4, %v1939_v35 }
 0x40e   :  { %v1564_v6 = vpop.f32.mrf.mxu1 }
 0x40f   :  { %v755_v7 = vmul.f32 0.01, %v749_v5 }
 0x410   :  { %v751_v32 = vpop.f32.mrf.mxu1 }
 0x411   :  { %v752_v8 = vadd.f32 %v751_v32, %v1939_v35  ;;  %v757_v63 = vmax.f32 %v749_v5, %v755_v7 }
 0x412   :  { %v1565_v43 = vpop.f32.mrf.mxu1 }
 0x413   :  { %v756_v9 = vmul.f32 0.01, %v752_v8  ;;  %v766_v23 = vmul.f32 %v757_v63, %v757_v63 }
 0x415   :  { %v758_v26 = vmax.f32 %v752_v8, %v756_v9 }
 0x417   :  { %v759_v24 = vadd.f32 %v758_v26, %v757_v63  ;;  %v767_v25 = vmul.f32 %v758_v26, %v758_v26 }
 0x419   :  { %v760_v22 = vrot.slane %v759_v24, 4  ;;  %v768_v36 = vadd.f32 %v767_v25, %v766_v23 }
 0x41b   :  { %v761_v38 = vadd.f32 %v760_v22, %v759_v24  ;;  %v769_v40 = vrot.slane %v768_v36, 4 }
 0x41d   :  { %v762_v41 = vrot.slane %v761_v38, 2  ;;  %v770_v46 = vadd.f32 %v769_v40, %v768_v36 }
 0x41f   :  { %v763_v47 = vadd.f32 %v762_v41, %v761_v38  ;;  %v771_v48 = vrot.slane %v770_v46, 2 }
 0x421   :  { %v764_v49 = vrot.slane %v763_v47, 1  ;;  %v772_v50 = vadd.f32 %v771_v48, %v770_v46 }
 0x423   :  { %v765_v51 = vadd.f32 %v764_v49, %v763_v47  ;;  %v773_v42 = vrot.slane %v772_v50, 1 }
 0x425   :  { %v774_v35 = vadd.f32 %v773_v42, %v772_v50  ;;  %v775_v52 = vmul.f32 0.0625, %v765_v51 }
 0x427   :  { %v776_v1 = vmul.f32 0.0625, %v774_v35  ;;  %v777_v27 = vmul.f32 %v775_v52, %v775_v52 }
 0x429   :  { %v778_v29 = vsub.f32 %v776_v1, %v777_v27 }
 0x42b   :  { %v779_v30 = vmax.f32 %v778_v29, 0.0 }
 0x42d   :  { %v780_v31 = vadd.f32 1e-05, %v779_v30 }
 0x42f   :  { %1739 = vrsqrt.f32 %v780_v31 }
 0x43c   :  { %v1740_v33 = vpop.eup %1739 }
 0x43d   :  { %v782_v45 = vmul.f32 %v1740_v33, %v1883_v21 }
 0x43f   :  { %v783_v54 = vmul.f32 %v782_v45, %v775_v52  ;;  %v791_v10 = vrot.slane %v782_v45, %v1945_v39 }
 0x441   :  { %v785_v53 = vrot.slane %v783_v54, 7  ;;  %v792_v56 = vmul.f32 %v791_v10, %v757_v63  ;;  %v793_v11 = vmul.f32 %v791_v10, %v758_v26  ;;  %v1707_v10 = vld [vmem:[#allocation2 + $0x138] sm:$0xff]  }
 0x443   :  { %v787_v55 = vsub.f32 %v1883_v21, %v785_v53 }
 0x445   :  { %v797_v12 = vrot.slane %v787_v55, %v348_v44  ;;  %v1710_v55 = vld [vmem:[#allocation2 + $0x120] sm:$0xff]  }
 0x447   :  { %v799_v58 = vadd.f32 %v797_v12, %v793_v11  ;;  %v798_v13 = vadd.f32 %v797_v12, %v792_v56  ;;  %v1712_v56 = vld [vmem:[#allocation2 + $0x110] sm:$0xff]   ;;  %v1713_v11 = vld [vmem:[#allocation2 + $0x108] sm:$0xff]   ;;  %v1714_v12 = vld [vmem:[#allocation2 + $0x100] sm:$0xff]  }
 0x449   :  { %v800_v14 = vpack.c.bf16 %v799_v58, %v798_v13  ;;  %v1715_v58 = vld [vmem:[#allocation2 + $0x178] sm:$0xff]   ;;  %v529_v13 = vrot.slane %v2036_v37, %v1893_v57 }
 0x44a   :  { %v1719_v57 = vld [vmem:[#allocation2 + $0x158] sm:$0xff]  }
 0x44b   :  { %1583 = vmatmul.mubr.bf16.vlgmr.msra.gmra.mxu0 %v800_v14 }
 0x44c   :  { %1622 = vmatprep.mubr.msk.bf16.mxu0 %vm1769_vm0, %v1768_v0  ;;  %1607 = vmatpush3.bf16.msra.mxu0 %v1707_v10 }
 0x44d   :  { %1608 = vmatprep.subr.bf16.mxu0 %v1768_v0 }
 0x50b   :  { %v835_v59 = vpop.f32.mrf.mxu0 }
 0x50c   :  { %v836_v60 = vadd.f32 %v835_v59, %v2025_v28  ;;  %v1716_v59 = vld [vmem:[#allocation2 + $0x170] sm:$0xff]  }
 0x50d   :  { %v1584_v62 = vpop.f32.mrf.mxu0 }
 0x50e   :  { %v842_v15 = vmul.f32 0.01, %v836_v60 }
 0x50f   :  { %v838_v17 = vpop.f32.mrf.mxu0 }
 0x510   :  { %v839_v3 = vadd.f32 %v838_v17, %v2025_v28  ;;  %v844_v5 = vmax.f32 %v836_v60, %v842_v15  ;;  %v1717_v17 = vld [vmem:[#allocation2 + $0x168] sm:$0xff]  }
 0x511   :  { %v1585_v4 = vpop.f32.mrf.mxu0 }
 0x512   :  { %v843_v6 = vmul.f32 0.01, %v839_v3  ;;  %v853_v44 = vmul.f32 %v844_v5, %v844_v5 }
 0x514   :  { %v845_v7 = vmax.f32 %v839_v3, %v843_v6 }
 0x516   :  { %v846_v32 = vadd.f32 %v845_v7, %v844_v5  ;;  %v854_v8 = vmul.f32 %v845_v7, %v845_v7 }
 0x518   :  { %v847_v43 = vrot.slane %v846_v32, 4  ;;  %v855_v63 = vadd.f32 %v854_v8, %v853_v44  ;;  %v616_v44 = vadd.f32 %v2084_v2, %v529_v13  ;;  %v1723_v2 = vld [vmem:[#allocation2 + $0x1b8] sm:$0xff]  }
 0x51a   :  { %v848_v9 = vadd.f32 %v847_v43, %v846_v32  ;;  %v856_v26 = vrot.slane %v855_v63, 4 }
 0x51c   :  { %v849_v23 = vrot.slane %v848_v9, 2  ;;  %v857_v24 = vadd.f32 %v856_v26, %v855_v63  ;;  %v1721_v26 = vld [vmem:[#allocation2 + $0x148] sm:$0xff]  }
 0x51e   :  { %v850_v25 = vadd.f32 %v849_v23, %v848_v9  ;;  %v858_v22 = vrot.slane %v857_v24, 2  ;;  %v1720_v9 = vld [vmem:[#allocation2 + $0x150] sm:$0xff]  }
 0x51f   :  { %v1724_v23 = vld [vmem:[#allocation2 + $0x1b0] sm:$0xff]  }
 0x520   :  { %v851_v36 = vrot.slane %v850_v25, 1  ;;  %v859_v38 = vadd.f32 %v858_v22, %v857_v24  ;;  %v1725_v24 = vld [vmem:[#allocation2 + $0x1a8] sm:$0xff]   ;;  %v1727_v22 = vld [vmem:[#allocation2 + $0x198] sm:$0xff]  }
 0x522   :  { %v852_v40 = vadd.f32 %v851_v36, %v850_v25  ;;  %v860_v41 = vrot.slane %v859_v38, 1  ;;  %v1726_v25 = vld [vmem:[#allocation2 + $0x1a0] sm:$0xff]   ;;  %v956_v36 = vrot.slane %v2036_v37, %v1897_v61 }
 0x523   :  { %v1730_v61 = vld [vmem:[#allocation2 + $0x180] sm:$0xff]  }
 0x524   :  { %v861_v28 = vadd.f32 %v860_v41, %v859_v38  ;;  %v862_v46 = vmul.f32 0.0625, %v852_v40 }
 0x526   :  { %v863_v47 = vmul.f32 0.0625, %v861_v28  ;;  %v864_v48 = vmul.f32 %v862_v46, %v862_v46 }
 0x528   :  { %v865_v49 = vsub.f32 %v863_v47, %v864_v48 }
 0x52a   :  { %v866_v50 = vmax.f32 %v865_v49, 0.0 }
 0x52c   :  { %v867_v51 = vadd.f32 1e-05, %v866_v50 }
 0x52e   :  { %1741 = vrsqrt.f32 %v867_v51 }
 0x53b   :  { %v1742_v42 = vpop.eup %1741 }
 0x53c   :  { %v869_v35 = vmul.f32 %v1742_v42, %v1883_v21  ;;  %v1708_v21 = vld [vmem:[#allocation2 + $0x130] sm:$0xff]  }
 0x53d   :  { %1609 = vmatpush3.bf16.msra.mxu0 %v1708_v21 }
 0x53e   :  { %v870_v52 = vmul.f32 %v869_v35, %v862_v46  ;;  %v878_v27 = vrot.slane %v869_v35, %v498_v18  ;;  %v1709_v18 = vld [vmem:[#allocation2 + $0x128] sm:$0xff]   ;;  %1610 = vmatprep.subr.bf16.mxu0 %v1768_v0  ;;  %v1728_v35 = vld [vmem:[#allocation2 + $0x190] sm:$0xff]  }
 0x540   :  { %v872_v1 = vrot.slane %v870_v52, 7  ;;  %v879_v30 = vmul.f32 %v878_v27, %v844_v5  ;;  %v880_v31 = vmul.f32 %v878_v27, %v845_v7  ;;  %v1718_v5 = vld [vmem:[#allocation2 + $0x160] sm:$0xff]   ;;  %v613_v7 = vadd.f32 %v2082_v16, %v529_v13  ;;  %v1729_v52 = vld [vmem:[#allocation2 + $0x188] sm:$0xff]  }
 0x541   :  { %1611 = vmatpush3.bf16.msra.mxu0 %v1709_v18  ;;  %v1722_v16 = vld [vmem:[#allocation2 + $0x140] sm:$0xff]  }
 0x542   :  { %v874_v29 = vsub.f32 %v2036_v37, %v872_v1  ;;  %1612 = vmatprep.subr.bf16.mxu0 %v1768_v0  ;;  %v1071_v1 = vrot.slane %v2036_v37, %v216_v34 }
 0x544   :  { %v884_v33 = vrot.slane %v874_v29, %v1878_v20  ;;  %v1711_v20 = vld [vmem:[#allocation2 + $0x118] sm:$0xff]  }
 0x545   :  { %1613 = vmatpush3.bf16.msra.mxu0 %v1710_v55 }
 0x546   :  { %v886_v45 = vadd.f32 %v884_v33, %v880_v31  ;;  %v885_v54 = vadd.f32 %v884_v33, %v879_v30  ;;  %1614 = vmatprep.subr.bf16.mxu0 %v1768_v0 }
 0x548   :  { %v887_v53 = vpack.c.bf16 %v886_v45, %v885_v54 }
 0x549   :  { %1615 = vmatpush3.bf16.msra.mxu0 %v1711_v20 }
 0x54a   :  { %1603 = vmatmul.mubr.bf16.vlgmr.msra.gmra.mxu1 %v887_v53  ;;  %1616 = vmatprep.subr.bf16.mxu0 %v1768_v0 }
 0x54b   :  { %1642 = vmatprep.mubr.msk.bf16.mxu1 %vm1769_vm0, %v1768_v0  ;;  %1627 = vmatpush3.bf16.msra.mxu1 %v1715_v58 }
 0x54c   :  { %1628 = vmatprep.subr.bf16.mxu1 %v1768_v0 }
 0x54d   :  { %1617 = vmatpush3.bf16.msra.mxu0 %v1712_v56 }
 0x54e   :  { %1618 = vmatprep.subr.bf16.mxu0 %v1768_v0 }
 0x54f   :  { %1629 = vmatpush3.bf16.msra.mxu1 %v1716_v59 }
 0x550   :  { %1630 = vmatprep.subr.bf16.mxu1 %v1768_v0 }
 0x551   :  { %1619 = vmatpush3.bf16.msra.mxu0 %v1713_v11 }
 0x552   :  { %1620 = vmatprep.subr.bf16.mxu0 %v1768_v0 }
 0x553   :  { %1631 = vmatpush3.bf16.msra.mxu1 %v1717_v17 }
 0x554   :  { %1632 = vmatprep.subr.bf16.mxu1 %v1768_v0 }
 0x555   :  { %1621 = vmatpush3.bf16.msra.mxu0 %v1714_v12 }
 0x556   :  { %1646 = vmatprep.subr.bf16.mxu0 %v1768_v0 }
 0x557   :  { %1633 = vmatpush3.bf16.msra.mxu1 %v1718_v5 }
 0x558   :  { %1634 = vmatprep.subr.bf16.mxu1 %v1768_v0 }
 0x55b   :  { %1635 = vmatpush3.bf16.msra.mxu1 %v1719_v57 }
 0x55c   :  { %1636 = vmatprep.subr.bf16.mxu1 %v1768_v0 }
 0x55f   :  { %1637 = vmatpush3.bf16.msra.mxu1 %v1720_v9 }
 0x560   :  { %1638 = vmatprep.subr.bf16.mxu1 %v1768_v0 }
 0x563   :  { %1639 = vmatpush3.bf16.msra.mxu1 %v1721_v26 }
 0x564   :  { %1640 = vmatprep.subr.bf16.mxu1 %v1768_v0 }
 0x567   :  { %1641 = vmatpush3.bf16.msra.mxu1 %v1722_v16 }
 0x60a   :  { %v922_v14 = vpop.f32.mrf.mxu1 }
 0x60b   :  { %v923_v60 = vadd.f32 %v922_v14, %v529_v13 }
 0x60c   :  { %v1604_v62 = vpop.f32.mrf.mxu1 }
 0x60d   :  { %929 = vrot.lane.b32.xlu0 %v923_v60, %s1770_s3 }
 0x60e   :  { %v925_v15 = vpop.f32.mrf.mxu1 }
 0x60f   :  { %v926_v3 = vadd.f32 %v925_v15, %v529_v13 }
 0x610   :  { %v1605_v4 = vpop.f32.mrf.mxu1 }
 0x611   :  { %931 = vrot.lane.b32.xlu0 %v926_v3, %s1770_s3 }
 0x67f   :  { %v930_v6 = vpop.permute.xlu0 %929 }
 0x680   :  { %v2121_v8 = vadd.f32 %v930_v6, %v613_v7 }
 0x683   :  { %v932_v32 = vpop.permute.xlu0 %931 }
 0x684   :  { %v2123_v43 = vadd.f32 %v932_v32, %v616_v44 }
 0x686   :  { %v935_v63 = vpack.c.bf16 %v2123_v43, %v2121_v8 }
 0x688   :  { %1623 = vmatmul.mubr.bf16.vlgmr.msra.gmra.mxu0 %v935_v63 }
 0x689   :  { %1662 = vmatprep.mubr.msk.bf16.mxu0 %vm1769_vm0, %v1768_v0  ;;  %1647 = vmatpush3.bf16.msra.mxu0 %v1723_v2 }
 0x68a   :  { %1648 = vmatprep.subr.bf16.mxu0 %v1768_v0 }
 0x68d   :  { %1649 = vmatpush3.bf16.msra.mxu0 %v1724_v23 }
 0x68e   :  { %1650 = vmatprep.subr.bf16.mxu0 %v1768_v0 }
 0x691   :  { %1651 = vmatpush3.bf16.msra.mxu0 %v1725_v24 }
 0x692   :  { %1652 = vmatprep.subr.bf16.mxu0 %v1768_v0 }
 0x695   :  { %1653 = vmatpush3.bf16.msra.mxu0 %v1726_v25 }
 0x696   :  { %1654 = vmatprep.subr.bf16.mxu0 %v1768_v0 }
 0x699   :  { %1655 = vmatpush3.bf16.msra.mxu0 %v1727_v22 }
 0x69a   :  { %1656 = vmatprep.subr.bf16.mxu0 %v1768_v0 }
 0x69d   :  { %1657 = vmatpush3.bf16.msra.mxu0 %v1728_v35 }
 0x69e   :  { %1658 = vmatprep.subr.bf16.mxu0 %v1768_v0 }
 0x6a1   :  { %1659 = vmatpush3.bf16.msra.mxu0 %v1729_v52 }
 0x6a2   :  { %1660 = vmatprep.subr.bf16.mxu0 %v1768_v0  ;;  %v1186_v0 = vrot.slane %v2036_v37, %v1945_v39 }
 0x6a5   :  { %1661 = vmatpush3.bf16.msra.mxu0 %v1730_v61 }
 0x748   :  { %v1039_v38 = vpop.f32.mrf.mxu0 }
 0x749   :  { %v1040_v40 = vadd.f32 %v1039_v38, %v956_v36 }
 0x74a   :  { %v1624_v41 = vpop.f32.mrf.mxu0 }
 0x74b   :  { %v1046_v46 = vmul.f32 0.01, %v1040_v40 }
 0x74c   :  { %v1042_v28 = vpop.f32.mrf.mxu0 }
 0x74d   :  { %v1043_v47 = vadd.f32 %v1042_v28, %v956_v36  ;;  %v1048_v50 = vmax.f32 %v1040_v40, %v1046_v46 }
 0x74e   :  { %v1625_v48 = vpop.f32.mrf.mxu0 }
 0x74f   :  { %v1047_v49 = vmul.f32 0.01, %v1043_v47 }
 0x751   :  { %v1049_v51 = vmax.f32 %v1043_v47, %v1047_v49 }
 0x753   :  { %v1050_v42 = vpack.c.bf16 %v1049_v51, %v1048_v50 }
 0x755   :  { %1643 = vmatmul.mubr.bf16.vlgmr.msra.gmra.mxu1 %v1050_v42 }
 0x815   :  { %v1154_v27 = vpop.f32.mrf.mxu1 }
 0x816   :  { %v1155_v29 = vadd.f32 %v1154_v27, %v1071_v1 }
 0x817   :  { %v1644_v30 = vpop.f32.mrf.mxu1 }
 0x818   :  { %v1161_v33 = vmul.f32 0.01, %v1155_v29 }
 0x819   :  { %v1157_v31 = vpop.f32.mrf.mxu1 }
 0x81a   :  { %v1158_v45 = vadd.f32 %v1157_v31, %v1071_v1  ;;  %v1163_v10 = vmax.f32 %v1155_v29, %v1161_v33 }
 0x81b   :  { %v1645_v54 = vpop.f32.mrf.mxu1 }
 0x81c   :  { %v1162_v53 = vmul.f32 0.01, %v1158_v45 }
 0x81e   :  { %v1164_v21 = vmax.f32 %v1158_v45, %v1162_v53 }
 0x820   :  { %v1165_v18 = vpack.c.bf16 %v1164_v21, %v1163_v10 }
 0x822   :  { %1663 = vmatmul.mubr.bf16.vlgmr.msra.gmra.mxu0 %v1165_v18 }
 0x8e2   :  { %v1269_v55 = vpop.f32.mrf.mxu0 }
 0x8e3   :  { %v1270_v20 = vadd.f32 %v1269_v55, %v1186_v0 }
 0x8e4   :  { %v1664_v19 = vpop.f32.mrf.mxu0 }
 0x8e5   :  { %1276 = vrot.lane.b32.xlu1 %v1270_v20, %s1771_s27 }
 0x8e6   :  { %v1272_v34 = vpop.f32.mrf.mxu0 }
 0x8e7   :  { %v1273_v56 = vadd.f32 %v1272_v34, %v1186_v0 }
 0x8e8   :  { %v1665_v11 = vpop.f32.mrf.mxu0 }
 0x8e9   :  { %1278 = vrot.lane.b32.xlu1 %v1273_v56, %s1771_s27 }
 0x957   :  { %v1277_v12 = vpop.permute.xlu1 %1276 }
 0x958   :  { %v1280_v58 = vadd.f32 %v1277_v12, %v2121_v8 }
 0x95a   :  { %1282 = vst [vmem:[%s2157_s4] sm:$0xff] %v1280_v58 }
 0x95b   :  { %v1279_v13 = vpop.permute.xlu1 %1278 }
 0x95c   :  { %v1281_v14 = vadd.f32 %v1279_v13, %v2123_v43 }
 0x95e   :  { %1283 = vst [vmem:[%s2157_s4 + $0x8] sm:$0xff] %v1281_v14 }
 0x95f   :  { %1288 = vsyncpa [#allocation3], 1 }

</bundles_post_ra>
